<compile_context>
chip_gen: v5e
topology: v5e:2x2
jax: 0.10.0
libtpu: 0.0.40
codegen_flags: <defaults>
</compile_context>

<pallas_src>
import math
import functools

import jax
import jax.numpy as jnp
from jax.experimental import pallas as pl
from jax.experimental.pallas import tpu as pltpu


# ------------------------------ tiled linear ------------------------------- #
# 512^3 f32 tiles: ~7 MiB double-buffered working set -> fits v5e's 16 MiB
# default scoped VMEM, v6e's 32 MiB and v7x's 64 MiB physical VMEM.  Multiples
# of 128 keep both the 4x128x128 (v5e) and 2x256x256 (v6e/v7x) MXUs fed.
_TM, _TN, _TK = 512, 512, 512


def _pick_tile(dim, target):
    """Largest tile <= target that divides dim (prefers 128/8 multiples).

    Never returns a huge full-dim block for non-divisible sizes (the old
    fallback could build a >VMEM tile for large M = B*L)."""
    if dim <= target:
        return dim
    for quantum in (128, 8, 1):
        t = (target // quantum) * quantum
        while t >= quantum:
            if dim % t == 0:
                return t
            t -= quantum
    return 1


def _linear_kernel(x_ref, w_ref, b_ref, o_ref, acc_ref):
    # x: (tm, tk), w: (tk, tn) -- weight pre-transposed at parameter-setup time
    # so the MXU contraction is canonical (no per-tile RHS transpose).
    @pl.when(pl.program_id(2) == 0)
    def _init():
        acc_ref[...] = jnp.zeros_like(acc_ref)

    acc_ref[...] += jnp.dot(x_ref[...], w_ref[...],
                            preferred_element_type=jnp.float32)

    @pl.when(pl.program_id(2) == pl.num_programs(2) - 1)
    def _finalize():
        o_ref[...] = (acc_ref[...] + b_ref[...]).astype(o_ref.dtype)


def linear(x, w, b):
    """y = x @ w + b with w already in (K, N) layout.  x: (M, K), b: (N,)."""
    M, K = x.shape
    N = w.shape[1]
    tm, tn, tk = _pick_tile(M, _TM), _pick_tile(N, _TN), _pick_tile(K, _TK)
    return pl.pallas_call(
        _linear_kernel,
        out_shape=jax.ShapeDtypeStruct((M, N), x.dtype),
        grid=(M // tm, N // tn, K // tk),
        in_specs=[
            pl.BlockSpec((tm, tk), lambda i, j, k: (i, k)),
            pl.BlockSpec((tk, tn), lambda i, j, k: (k, j)),
            pl.BlockSpec((1, tn), lambda i, j, k: (0, j)),
        ],
        out_specs=pl.BlockSpec((tm, tn), lambda i, j, k: (i, j)),
        scratch_shapes=[pltpu.VMEM((tm, tn), jnp.float32)],
        compiler_params=pltpu.CompilerParams(
            dimension_semantics=("parallel", "parallel", "arbitrary")),
    )(x, w, b.reshape(1, N))


# ----------------------------- attention kernel ---------------------------- #

def _pick_head_group(n_heads, n_embd):
    # Process heads in groups of G so the score matrix stays ~128 lanes wide
    # while wasting only Gx (not Hx) flops on the block-diagonal trick; for
    # F >= 128 this is per-head (G = 1) and the mask add is skipped entirely.
    g = min(n_heads, max(1, 128 // n_embd))
    while n_heads % g:
        g -= 1
    return g


def _pick_batch_block(batch, seq_len, hf):
    # Several batch elements per grid step amortize the ~0.35us/step overhead;
    # cap the buffered qkv block so it stays VMEM-friendly on v7x (64 MiB).
    budget = 4 * 1024 * 1024
    bb = batch
    while bb > 1 and (batch % bb or bb * seq_len * 3 * hf * 4 > budget):
        bb -= 1
    return bb


def _attn_kernel(mask_ref, qkv_ref, o_ref, *, n_heads, n_embd, seq_len, group):
    H, F, L, G = n_heads, n_embd, seq_len, group
    HF, GF = H * F, G * F
    scale = 1.0 / math.sqrt(L)          # torch: 1/sqrt(k.size(-1)) == 1/sqrt(L)

    qkv = qkv_ref[...]                  # (Bb, L, 3*HF), head-major columns
    mask = mask_ref[...]                # (GF, GF) additive 0 / -1e30 (resident)

    outs = []
    for g in range(H // G):             # static head-group loop
        lo = g * GF
        q = qkv[:, :, lo:lo + GF] * scale                    # (Bb, L, GF)
        k = qkv[:, :, HF + lo:HF + lo + GF]
        v = qkv[:, :, 2 * HF + lo:2 * HF + lo + GF]

        # s[b, jF+f, j'F+f'] = sum_l q[b,l,jF+f] * k[b,l,j'F+f']
        s = jax.lax.dot_general(q, k, (((1,), (1,)), ((0,), (0,))),
                                preferred_element_type=jnp.float32)
        if G > 1:
            s = s + mask                 # off same-head diagonal blocks -> -1e30
        s = s - jnp.max(s, axis=-1, keepdims=True)
        p = jnp.exp(s)                   # masked entries underflow to exactly 0
        p = p * pl.reciprocal(jnp.sum(p, axis=-1, keepdims=True), approx=True)

        # y[b, jF+f, l] = sum_{f'} p[b, jF+f, jF+f'] * v[b, l, jF+f']
        y = jax.lax.dot_general(p, v, (((2,), (2,)), ((0,), (0,))),
                                preferred_element_type=jnp.float32)

        # torch layout: out[b, f, h*L + l] = y_head(h)[b, f, l]; heads emitted
        # in ascending global order so the lane concat lands in-place.
        outs.extend(y[:, j * F:(j + 1) * F, :] for j in range(G))

    # One wide store per grid step instead of H narrow masked stores.
    o_ref[...] = jnp.concatenate(outs, axis=2).astype(o_ref.dtype)


def attention(qkv, B, L, F, H):
    """qkv: (B, L, 3*H*F) head-major fused projections -> (B, F, H*L)."""
    HF = H * F
    G = _pick_head_group(H, F)
    Bb = _pick_batch_block(B, L, HF)
    GF = G * F

    # Precomputed additive block-diagonal mask (grid-invariant input block).
    head = jnp.arange(GF, dtype=jnp.int32) // F
    mask = jnp.where(head[:, None] == head[None, :], 0.0, -1e30)
    mask = mask.astype(jnp.float32)

    kern = functools.partial(_attn_kernel, n_heads=H, n_embd=F, seq_len=L,
                             group=G)
    # TODO(synk): for very long L on v7x, tile L with an online softmax so the
    # (Bb, L, 3*HF) block + (GF, GF) scores stay under the 64 MiB VMEM budget.
    return pl.pallas_call(
        kern,
        out_shape=jax.ShapeDtypeStruct((B, F, H * L), qkv.dtype),
        grid=(B // Bb,),
        in_specs=[
            pl.BlockSpec((GF, GF), lambda b: (0, 0)),            # resident mask
            pl.BlockSpec((Bb, L, 3 * HF), lambda b: (b, 0, 0)),  # one fused DMA
        ],
        out_specs=pl.BlockSpec((Bb, F, H * L), lambda b: (b, 0, 0)),
        compiler_params=pltpu.CompilerParams(
            dimension_semantics=("parallel",)),
    )(mask, qkv)


# -------------------------------- forward ---------------------------------- #

def multihead_attention(x, fused, n_heads):
    B, L, F = x.shape
    H = n_heads
    HF = H * F

    qkv = linear(x.reshape(B * L, F), fused["w_qkv"], fused["b_qkv"])
    qkv = qkv.reshape(B, L, 3 * HF)                 # free row-major reinterpret

    y = attention(qkv, B, L, F, H)                  # (B, F, H*L), torch flat order
    y2 = y.reshape(B * L, HF)                       # free reinterpret (== .view)

    out = linear(y2, fused["wp"], fused["bp"])      # (B*L, F)
    return out.reshape(B, L, F)


# -------------------------- params / reference / main ----------------------- #

def init_params(key, n_embd, n_heads):
    # Matches torch nn.Linear default init (uniform +-1/sqrt(fan_in)).
    F, H = n_embd, n_heads
    ks = jax.random.split(key, 8)

    def lin_init(kw, kb, fan_in, fan_out):
        bound = 1.0 / math.sqrt(fan_in)
        w = jax.random.uniform(kw, (fan_out, fan_in), jnp.float32, -bound, bound)
        b = jax.random.uniform(kb, (fan_out,), jnp.float32, -bound, bound)
        return w, b

    wk, bk = lin_init(ks[0], ks[1], F, F * H)
    wq, bq = lin_init(ks[2], ks[3], F, F * H)
    wv, bv = lin_init(ks[4], ks[5], F, F * H)
    wp, bp = lin_init(ks[6], ks[7], F * H, F)
    return dict(wk=wk, bk=bk, wq=wq, bq=bq, wv=wv, bv=bv, wp=wp, bp=bp)


def fuse_params(params, n_embd, n_heads):
    """One-time parameter prep: fuse Q/K/V, reorder output columns head-major
    (h*F + f instead of torch's f*H + h) and transpose the weights to (K, N)
    so the GEMM kernel contracts canonically with no runtime relayouts."""
    F, H = n_embd, n_heads

    def head_major(w, b):
        w = w.reshape(F, H, F).transpose(1, 0, 2).reshape(H * F, F)
        b = b.reshape(F, H).transpose(1, 0).reshape(H * F)
        return w, b

    wq, bq = head_major(params["wq"], params["bq"])
    wk, bk = head_major(params["wk"], params["bk"])
    wv, bv = head_major(params["wv"], params["bv"])
    w_qkv = jnp.concatenate([wq, wk, wv], axis=0)          # (3*H*F, F)
    return dict(
        w_qkv=jnp.asarray(w_qkv.T),                        # (F, 3*H*F)
        b_qkv=jnp.concatenate([bq, bk, bv], axis=0),       # (3*H*F,)
        wp=jnp.asarray(params["wp"].T),                    # (H*F, F)
        bp=params["bp"])


def reference(x, params, n_heads):
    # Pure-JAX mirror of the PyTorch forward (validation only).
    B, L, F = x.shape
    H = n_heads
    lin = lambda t, w, b: t @ w.T + b
    k = lin(x, params["wk"], params["bk"]).reshape(B, L, F, H).transpose(0, 3, 2, 1)
    q = lin(x, params["wq"], params["bq"]).reshape(B, L, F, H).transpose(0, 3, 2, 1)
    v = lin(x, params["wv"], params["bv"]).reshape(B, L, F, H).transpose(0, 3, 2, 1)
    att = jnp.einsum("bhfl,bhgl->bhfg", q, k) * (1.0 / math.sqrt(L))
    att = jax.nn.softmax(att, axis=-1)
    y = jnp.einsum("bhfg,bhgl->bhfl", att, v)
    y = jnp.transpose(y, (0, 2, 1, 3)).reshape(B, L, F * H)
    return lin(y, params["wp"], params["bp"])


if __name__ == "__main__":
    B, L, F, H = 2, 8, 32, 4          # batch, seq, n_embd, n_heads
    key = jax.random.PRNGKey(0)
    kx, kp = jax.random.split(key)
    x = jax.random.normal(kx, (B, L, F), dtype=jnp.float32)

    params = init_params(kp, F, H)
    fused = fuse_params(params, F, H)           # one-time parameter setup

    fwd = jax.jit(multihead_attention, static_argnums=2)
    out = jax.block_until_ready(fwd(x, fused, H))

    ref = reference(x, params, H)
    assert out.shape == (B, L, F)
    # Tolerance covers the approximate-EUP reciprocal in the softmax.
    err = float(jnp.max(jnp.abs(out - ref)))
    assert jnp.allclose(out, ref, atol=2e-3, rtol=2e-3), err
    print("KERNEL_OK")
</pallas_src>

<mosaic_0001>
module attributes {stable_mosaic.version = 11 : i64} {
  func.func @_linear_kernel(%arg0: i32, %arg1: i32, %arg2: i32, %arg3: memref<16x32xf32, #tpu.memory_space<vmem>>, %arg4: memref<32x384xf32, #tpu.memory_space<vmem>>, %arg5: memref<1x384xf32, #tpu.memory_space<vmem>>, %arg6: memref<16x384xf32, #tpu.memory_space<vmem>>, %arg7: memref<16x384xf32, #tpu.memory_space<vmem>>) attributes {dimension_semantics = [#tpu.dimension_semantics<parallel>, #tpu.dimension_semantics<parallel>, #tpu.dimension_semantics<arbitrary>], iteration_bounds = array<i64: 1, 1, 1>, scalar_prefetch = 0 : i64, scratch_operands = 1 : i64, tpu.core_type = #tpu.core_type<tc>, window_params = [{transform_indices = @transform_0, window_bounds = array<i64: 16, 32>}, {transform_indices = @transform_1, window_bounds = array<i64: 32, 384>}, {transform_indices = @transform_2, window_bounds = array<i64: 1, 384>}, {transform_indices = @transform_3, window_bounds = array<i64: 16, 384>}]} {
    %c0_i32 = arith.constant 0 : i32
    %0 = arith.cmpi eq, %arg2, %c0_i32 : i32
    %1 = arith.extui %0 : i1 to i32
    %c0_i32_0 = arith.constant 0 : i32
    %2 = arith.cmpi ne, %1, %c0_i32_0 : i32
    scf.if %2 {
      %cst_10 = arith.constant 0.000000e+00 : f32
      %12 = vector.broadcast %cst_10 : f32 to vector<16x384xf32>
      %c0_11 = arith.constant 0 : index
      %c0_12 = arith.constant 0 : index
      %13 = vector.load %arg7[%c0_11, %c0_12] : memref<16x384xf32, #tpu.memory_space<vmem>>, vector<16x384xf32>
      tpu.vector_store %arg7[%c0_11, %c0_12], %12 {strides = array<i32>} : memref<16x384xf32, #tpu.memory_space<vmem>>, vector<16x384xf32>,
    } else {
    }
    %c0 = arith.constant 0 : index
    %c0_1 = arith.constant 0 : index
    %3 = vector.load %arg7[%c0, %c0_1] : memref<16x384xf32, #tpu.memory_space<vmem>>, vector<16x384xf32>
    %c0_2 = arith.constant 0 : index
    %c0_3 = arith.constant 0 : index
    %4 = vector.load %arg3[%c0_2, %c0_3] : memref<16x32xf32, #tpu.memory_space<vmem>>, vector<16x32xf32>
    %c0_4 = arith.constant 0 : index
    %c0_5 = arith.constant 0 : index
    %5 = vector.load %arg4[%c0_4, %c0_5] : memref<32x384xf32, #tpu.memory_space<vmem>>, vector<32x384xf32>
    %cst = arith.constant dense<0.000000e+00> : vector<16x384xf32>
    %6 = tpu.matmul %4, %5, %cst {dimension_numbers = #tpu.dot_dimension_numbers<[1], [0], [0], [1], [0, 0, 1, 1], [], []>} : vector<16x32xf32>, vector<32x384xf32>, vector<16x384xf32> -> vector<16x384xf32>
    %7 = arith.addf %3, %6 : vector<16x384xf32>
    %c0_6 = arith.constant 0 : index
    %c0_7 = arith.constant 0 : index
    %8 = vector.load %arg7[%c0_6, %c0_7] : memref<16x384xf32, #tpu.memory_space<vmem>>, vector<16x384xf32>
    tpu.vector_store %arg7[%c0_6, %c0_7], %7 {strides = array<i32>} : memref<16x384xf32, #tpu.memory_space<vmem>>, vector<16x384xf32>,
    %c0_i32_8 = arith.constant 0 : i32
    %9 = arith.cmpi eq, %arg2, %c0_i32_8 : i32
    %10 = arith.extui %9 : i1 to i32
    %c0_i32_9 = arith.constant 0 : i32
    %11 = arith.cmpi ne, %10, %c0_i32_9 : i32
    scf.if %11 {
      %c0_10 = arith.constant 0 : index
      %c0_11 = arith.constant 0 : index
      %12 = vector.load %arg7[%c0_10, %c0_11] : memref<16x384xf32, #tpu.memory_space<vmem>>, vector<16x384xf32>
      %c0_12 = arith.constant 0 : index
      %c0_13 = arith.constant 0 : index
      %13 = vector.load %arg5[%c0_12, %c0_13] : memref<1x384xf32, #tpu.memory_space<vmem>>, vector<1x384xf32>
      %14 = vector.broadcast %13 : vector<1x384xf32> to vector<16x384xf32>
      %15 = arith.addf %12, %14 : vector<16x384xf32>
      %c0_14 = arith.constant 0 : index
      %c0_15 = arith.constant 0 : index
      %16 = vector.load %arg6[%c0_14, %c0_15] : memref<16x384xf32, #tpu.memory_space<vmem>>, vector<16x384xf32>
      tpu.vector_store %arg6[%c0_14, %c0_15], %15 {strides = array<i32>} : memref<16x384xf32, #tpu.memory_space<vmem>>, vector<16x384xf32>,
    } else {
    }
    return
  }
  func.func @transform_0(%arg0: i32, %arg1: i32, %arg2: i32) -> (i32, i32) {
    %c0_i32 = arith.constant 0 : i32
    return %arg0, %arg2 : i32, i32
  }
  func.func @transform_1(%arg0: i32, %arg1: i32, %arg2: i32) -> (i32, i32) {
    %c0_i32 = arith.constant 0 : i32
    return %arg2, %arg1 : i32, i32
  }
  func.func @transform_2(%arg0: i32, %arg1: i32, %arg2: i32) -> (i32, i32) {
    %c0_i32 = arith.constant 0 : i32
    %c0_i32_0 = arith.constant 0 : i32
    return %c0_i32, %arg1 : i32, i32
  }
  func.func @transform_3(%arg0: i32, %arg1: i32, %arg2: i32) -> (i32, i32) {
    %c0_i32 = arith.constant 0 : i32
    return %arg0, %arg1 : i32, i32
  }
}

module attributes {stable_mosaic.version = 11 : i64} {
  func.func @_attn_kernel(%arg0: i32, %arg1: memref<128x128xf32, #tpu.memory_space<vmem>>, %arg2: memref<2x8x384xf32, #tpu.memory_space<vmem>>, %arg3: memref<2x32x32xf32, #tpu.memory_space<vmem>>) attributes {dimension_semantics = [#tpu.dimension_semantics<parallel>], iteration_bounds = array<i64: 1>, scalar_prefetch = 0 : i64, scratch_operands = 0 : i64, tpu.core_type = #tpu.core_type<tc>, window_params = [{pipeline_mode = #tpu.pipeline_mode<synchronous>, transform_indices = @transform_0, window_bounds = array<i64: 128, 128>}, {transform_indices = @transform_1, window_bounds = array<i64: 2, 8, 384>}, {transform_indices = @transform_2, window_bounds = array<i64: 2, 32, 32>}]} {
    %c0 = arith.constant 0 : index
    %c0_0 = arith.constant 0 : index
    %c0_1 = arith.constant 0 : index
    %0 = vector.load %arg2[%c0, %c0_0, %c0_1] : memref<2x8x384xf32, #tpu.memory_space<vmem>>, vector<2x8x384xf32>
    %c0_2 = arith.constant 0 : index
    %c0_3 = arith.constant 0 : index
    %1 = vector.load %arg1[%c0_2, %c0_3] : memref<128x128xf32, #tpu.memory_space<vmem>>, vector<128x128xf32>
    %2 = vector.extract_strided_slice %0 {offsets = [0, 0, 0], sizes = [2, 8, 128], strides = [1, 1, 1]} : vector<2x8x384xf32> to vector<2x8x128xf32>
    %cst = arith.constant 0.353553385 : f32
    %3 = vector.broadcast %cst : f32 to vector<2x8x128xf32>
    %4 = arith.mulf %2, %3 : vector<2x8x128xf32>
    %5 = vector.extract_strided_slice %0 {offsets = [0, 0, 128], sizes = [2, 8, 128], strides = [1, 1, 1]} : vector<2x8x384xf32> to vector<2x8x128xf32>
    %6 = vector.extract_strided_slice %0 {offsets = [0, 0, 256], sizes = [2, 8, 128], strides = [1, 1, 1]} : vector<2x8x384xf32> to vector<2x8x128xf32>
    %cst_4 = arith.constant dense<0.000000e+00> : vector<2x128x128xf32>
    %7 = tpu.matmul %4, %5, %cst_4 {dimension_numbers = #tpu.dot_dimension_numbers<[1], [1], [2], [2], [0, 0, 0, 2, 1, 2], [0], [0]>} : vector<2x8x128xf32>, vector<2x8x128xf32>, vector<2x128x128xf32> -> vector<2x128x128xf32>
    %8 = vector.shape_cast %1 : vector<128x128xf32> to vector<1x128x128xf32>
    %9 = vector.broadcast %8 : vector<1x128x128xf32> to vector<2x128x128xf32>
    %10 = arith.addf %7, %9 : vector<2x128x128xf32>
    %cst_5 = arith.constant dense<0xFF800000> : vector<2x128xf32>
    %11 = vector.multi_reduction <maximumf>, %10, %cst_5 [2] : vector<2x128x128xf32> to vector<2x128xf32>
    %12 = vector.shape_cast %11 : vector<2x128xf32> to vector<2x128x1xf32>
    %13 = vector.broadcast %12 : vector<2x128x1xf32> to vector<2x128x128xf32>
    %14 = arith.subf %10, %13 : vector<2x128x128xf32>
    %15 = math.exp %14 : vector<2x128x128xf32>
    %cst_6 = arith.constant dense<0.000000e+00> : vector<2x128xf32>
    %16 = vector.multi_reduction <add>, %15, %cst_6 [2] : vector<2x128x128xf32> to vector<2x128xf32>
    %17 = vector.shape_cast %16 : vector<2x128xf32> to vector<2x128x1xf32>
    %18 = tpu.reciprocal %17 {approx = true} : vector<2x128x1xf32> -> vector<2x128x1xf32>
    %19 = vector.broadcast %18 : vector<2x128x1xf32> to vector<2x128x128xf32>
    %20 = arith.mulf %15, %19 : vector<2x128x128xf32>
    %cst_7 = arith.constant dense<0.000000e+00> : vector<2x128x8xf32>
    %21 = tpu.matmul %20, %6, %cst_7 {dimension_numbers = #tpu.dot_dimension_numbers<[2], [2], [1], [1], [0, 0, 0, 1, 1, 1], [0], [0]>} : vector<2x128x128xf32>, vector<2x8x128xf32>, vector<2x128x8xf32> -> vector<2x128x8xf32>
    %22 = vector.extract_strided_slice %21 {offsets = [0, 0, 0], sizes = [2, 32, 8], strides = [1, 1, 1]} : vector<2x128x8xf32> to vector<2x32x8xf32>
    %23 = vector.extract_strided_slice %21 {offsets = [0, 32, 0], sizes = [2, 32, 8], strides = [1, 1, 1]} : vector<2x128x8xf32> to vector<2x32x8xf32>
    %24 = vector.extract_strided_slice %21 {offsets = [0, 64, 0], sizes = [2, 32, 8], strides = [1, 1, 1]} : vector<2x128x8xf32> to vector<2x32x8xf32>
    %25 = vector.extract_strided_slice %21 {offsets = [0, 96, 0], sizes = [2, 32, 8], strides = [1, 1, 1]} : vector<2x128x8xf32> to vector<2x32x8xf32>
    %26 = tpu.concatenate %22, %23, %24, %25 in 2 : vector<2x32x8xf32>, vector<2x32x8xf32>, vector<2x32x8xf32>, vector<2x32x8xf32> -> vector<2x32x32xf32>
    %c0_8 = arith.constant 0 : index
    %c0_9 = arith.constant 0 : index
    %c0_10 = arith.constant 0 : index
    %27 = vector.load %arg3[%c0_8, %c0_9, %c0_10] : memref<2x32x32xf32, #tpu.memory_space<vmem>>, vector<2x32x32xf32>
    tpu.vector_store %arg3[%c0_8, %c0_9, %c0_10], %26 {strides = array<i32>} : memref<2x32x32xf32, #tpu.memory_space<vmem>>, vector<2x32x32xf32>,
    return
  }
  func.func @transform_0(%arg0: i32) -> (i32, i32) {
    %c0_i32 = arith.constant 0 : i32
    %c0_i32_0 = arith.constant 0 : i32
    %c0_i32_1 = arith.constant 0 : i32
    return %c0_i32, %c0_i32_0 : i32, i32
  }
  func.func @transform_1(%arg0: i32) -> (i32, i32, i32) {
    %c0_i32 = arith.constant 0 : i32
    %c0_i32_0 = arith.constant 0 : i32
    %c0_i32_1 = arith.constant 0 : i32
    return %arg0, %c0_i32, %c0_i32_0 : i32, i32, i32
  }
  func.func @transform_2(%arg0: i32) -> (i32, i32, i32) {
    %c0_i32 = arith.constant 0 : i32
    %c0_i32_0 = arith.constant 0 : i32
    %c0_i32_1 = arith.constant 0 : i32
    return %arg0, %c0_i32, %c0_i32_0 : i32, i32, i32
  }
}

module attributes {stable_mosaic.version = 11 : i64} {
  func.func @_linear_kernel(%arg0: i32, %arg1: i32, %arg2: i32, %arg3: memref<16x128xf32, #tpu.memory_space<vmem>>, %arg4: memref<128x32xf32, #tpu.memory_space<vmem>>, %arg5: memref<1x32xf32, #tpu.memory_space<vmem>>, %arg6: memref<16x32xf32, #tpu.memory_space<vmem>>, %arg7: memref<16x32xf32, #tpu.memory_space<vmem>>) attributes {dimension_semantics = [#tpu.dimension_semantics<parallel>, #tpu.dimension_semantics<parallel>, #tpu.dimension_semantics<arbitrary>], iteration_bounds = array<i64: 1, 1, 1>, scalar_prefetch = 0 : i64, scratch_operands = 1 : i64, tpu.core_type = #tpu.core_type<tc>, window_params = [{transform_indices = @transform_0, window_bounds = array<i64: 16, 128>}, {transform_indices = @transform_1, window_bounds = array<i64: 128, 32>}, {transform_indices = @transform_2, window_bounds = array<i64: 1, 32>}, {transform_indices = @transform_3, window_bounds = array<i64: 16, 32>}]} {
    %c0_i32 = arith.constant 0 : i32
    %0 = arith.cmpi eq, %arg2, %c0_i32 : i32
    %1 = arith.extui %0 : i1 to i32
    %c0_i32_0 = arith.constant 0 : i32
    %2 = arith.cmpi ne, %1, %c0_i32_0 : i32
    scf.if %2 {
      %cst_10 = arith.constant 0.000000e+00 : f32
      %12 = vector.broadcast %cst_10 : f32 to vector<16x32xf32>
      %c0_11 = arith.constant 0 : index
      %c0_12 = arith.constant 0 : index
      %13 = vector.load %arg7[%c0_11, %c0_12] : memref<16x32xf32, #tpu.memory_space<vmem>>, vector<16x32xf32>
      tpu.vector_store %arg7[%c0_11, %c0_12], %12 {strides = array<i32>} : memref<16x32xf32, #tpu.memory_space<vmem>>, vector<16x32xf32>,
    } else {
    }
    %c0 = arith.constant 0 : index
    %c0_1 = arith.constant 0 : index
    %3 = vector.load %arg7[%c0, %c0_1] : memref<16x32xf32, #tpu.memory_space<vmem>>, vector<16x32xf32>
    %c0_2 = arith.constant 0 : index
    %c0_3 = arith.constant 0 : index
    %4 = vector.load %arg3[%c0_2, %c0_3] : memref<16x128xf32, #tpu.memory_space<vmem>>, vector<16x128xf32>
    %c0_4 = arith.constant 0 : index
    %c0_5 = arith.constant 0 : index
    %5 = vector.load %arg4[%c0_4, %c0_5] : memref<128x32xf32, #tpu.memory_space<vmem>>, vector<128x32xf32>
    %cst = arith.constant dense<0.000000e+00> : vector<16x32xf32>
    %6 = tpu.matmul %4, %5, %cst {dimension_numbers = #tpu.dot_dimension_numbers<[1], [0], [0], [1], [0, 0, 1, 1], [], []>} : vector<16x128xf32>, vector<128x32xf32>, vector<16x32xf32> -> vector<16x32xf32>
    %7 = arith.addf %3, %6 : vector<16x32xf32>
    %c0_6 = arith.constant 0 : index
    %c0_7 = arith.constant 0 : index
    %8 = vector.load %arg7[%c0_6, %c0_7] : memref<16x32xf32, #tpu.memory_space<vmem>>, vector<16x32xf32>
    tpu.vector_store %arg7[%c0_6, %c0_7], %7 {strides = array<i32>} : memref<16x32xf32, #tpu.memory_space<vmem>>, vector<16x32xf32>,
    %c0_i32_8 = arith.constant 0 : i32
    %9 = arith.cmpi eq, %arg2, %c0_i32_8 : i32
    %10 = arith.extui %9 : i1 to i32
    %c0_i32_9 = arith.constant 0 : i32
    %11 = arith.cmpi ne, %10, %c0_i32_9 : i32
    scf.if %11 {
      %c0_10 = arith.constant 0 : index
      %c0_11 = arith.constant 0 : index
      %12 = vector.load %arg7[%c0_10, %c0_11] : memref<16x32xf32, #tpu.memory_space<vmem>>, vector<16x32xf32>
      %c0_12 = arith.constant 0 : index
      %c0_13 = arith.constant 0 : index
      %13 = vector.load %arg5[%c0_12, %c0_13] : memref<1x32xf32, #tpu.memory_space<vmem>>, vector<1x32xf32>
      %14 = vector.broadcast %13 : vector<1x32xf32> to vector<16x32xf32>
      %15 = arith.addf %12, %14 : vector<16x32xf32>
      %c0_14 = arith.constant 0 : index
      %c0_15 = arith.constant 0 : index
      %16 = vector.load %arg6[%c0_14, %c0_15] : memref<16x32xf32, #tpu.memory_space<vmem>>, vector<16x32xf32>
      tpu.vector_store %arg6[%c0_14, %c0_15], %15 {strides = array<i32>} : memref<16x32xf32, #tpu.memory_space<vmem>>, vector<16x32xf32>,
    } else {
    }
    return
  }
  func.func @transform_0(%arg0: i32, %arg1: i32, %arg2: i32) -> (i32, i32) {
    %c0_i32 = arith.constant 0 : i32
    return %arg0, %arg2 : i32, i32
  }
  func.func @transform_1(%arg0: i32, %arg1: i32, %arg2: i32) -> (i32, i32) {
    %c0_i32 = arith.constant 0 : i32
    return %arg2, %arg1 : i32, i32
  }
  func.func @transform_2(%arg0: i32, %arg1: i32, %arg2: i32) -> (i32, i32) {
    %c0_i32 = arith.constant 0 : i32
    %c0_i32_0 = arith.constant 0 : i32
    return %c0_i32, %arg1 : i32, i32
  }
  func.func @transform_3(%arg0: i32, %arg1: i32, %arg2: i32) -> (i32, i32) {
    %c0_i32 = arith.constant 0 : i32
    return %arg0, %arg1 : i32, i32
  }
}

</mosaic_0001>

<bundles_post_ra>
// kernel: multihead_attention.5
= control target key start
LH: loop header
LB: loop body
LE: loop exit
PB: predicated region body
PF: predicated region fallthrough
CT: control target
= control target key end

     0   :  { %vm19_vm0 = vcmask 261120   ;;  %v148_v2 = vmov 0.0   ;;  %s238_s0 = inlined_call_operand.vmem [shape: f32[16,128], index: 0, kind: input, shape index: {}]   ;;  %s239_s1 = inlined_call_operand.vmem [shape: f32[128,32], index: 1, kind: input, shape index: {}]   ;;  %s240_s2 = inlined_call_operand.vmem [shape: f32[1,32], index: 2, kind: input, shape index: {}]   ;;  %s241_s3 = inlined_call_operand.hbm [shape: f32[16,32], index: 3, kind: output, shape index: {}]  }
   0x1   :  { %v41_v0 = vld [vmem:[%s239_s1 + $0x78] sm:$0xff]  ;;  %v40_v1 = vld [vmem:[%s239_s1 + $0x70] sm:$0xff]  ;;  %20 = vst.msk [vmem:[#allocation2] sm:$0xff] %vm19_vm0, %v148_v2  ;;  %v39_v3 = vld [vmem:[%s239_s1 + $0x68] sm:$0xff] }
   0x2   :  { %42 = vmatpush.msra.mxu0 %v41_v0  ;;  %101 = vmatpush.msra.mxu1 %v41_v0  ;;  %21 = vst.msk [vmem:[#allocation2 + $0x8] sm:$0xff] %vm19_vm0, %v148_v2  ;;  %v38_v4 = vld [vmem:[%s239_s1 + $0x60] sm:$0xff]  ;;  %v37_v5 = vld [vmem:[%s239_s1 + $0x58] sm:$0xff] }
   0x4   :  { %43 = vmatpush.msra.mxu0 %v40_v1  ;;  %102 = vmatpush.msra.mxu1 %v40_v1 }
   0x6   :  { %44 = vmatpush.msra.mxu0 %v39_v3  ;;  %103 = vmatpush.msra.mxu1 %v39_v3 }
   0x7   :  { %8 = vsyncpa [#allocation4], 0  ;;  %v36_v6 = vld [vmem:[%s239_s1 + $0x50] sm:$0xff]  ;;  %v35_v7 = vld [vmem:[%s239_s1 + $0x48] sm:$0xff]  ;;  %s149_s22 = smov [#allocation3]   ;;  %s89_s25 = sshll.u32 %s241_s3, 4  ;;  %s90_s25 = int_to_ptr.hbm [resolvable:$true] %s89_s25 }
   0x8   :  { %45 = vmatpush.msra.mxu0 %v38_v4  ;;  %104 = vmatpush.msra.mxu1 %v38_v4  ;;  %v34_v8 = vld [vmem:[%s239_s1 + $0x40] sm:$0xff]  ;;  %v33_v9 = vld [vmem:[%s239_s1 + $0x38] sm:$0xff]  ;;  %v32_v10 = vld [vmem:[%s239_s1 + $0x30] sm:$0xff]  ;;  %s150_s26 = smov 128   ;;  %s151_s27 = smov 8  }
   0x9   :  { %v31_v11 = vld [vmem:[%s239_s1 + $0x28] sm:$0xff]  ;;  %v30_v12 = vld [vmem:[%s239_s1 + $0x20] sm:$0xff]  ;;  %v29_v13 = vld [vmem:[%s239_s1 + $0x18] sm:$0xff] }
   0xa   :  { %46 = vmatpush.msra.mxu0 %v37_v5  ;;  %105 = vmatpush.msra.mxu1 %v37_v5  ;;  %v28_v14 = vld [vmem:[%s239_s1 + $0x10] sm:$0xff]  ;;  %v27_v15 = vld [vmem:[%s239_s1 + $0x8] sm:$0xff]  ;;  %v26_v16 = vld [vmem:[%s239_s1] sm:$0xff] }
   0xb   :  { %v24_v17 = vld [vmem:[%s238_s0] sm:$0xff]  ;;  %v25_v18 = vld [vmem:[%s238_s0 + $0x8] sm:$0xff]  ;;  %s87_s0 = sshll.u32 %s149_s22, 4  ;;  %s88_s0 = int_to_ptr.vmem [resolvable:$true] %s87_s0 }
   0xc   :  { %47 = vmatpush.msra.mxu0 %v36_v6  ;;  %106 = vmatpush.msra.mxu1 %v36_v6  ;;  %v22_v19 = vld [vmem:[#allocation2] sm:$0xff]  ;;  %v23_v20 = vld [vmem:[#allocation2 + $0x8] sm:$0xff] }
   0xd   :  { %v121_v25 = vld [vmem:[%s240_s2] ss:$0 sm:$0xff] }
   0xe   :  { %48 = vmatpush.msra.mxu0 %v35_v7  ;;  %107 = vmatpush.msra.mxu1 %v35_v7 }
  0x10   :  { %49 = vmatpush.msra.mxu0 %v34_v8  ;;  %108 = vmatpush.msra.mxu1 %v34_v8 }
  0x12   :  { %50 = vmatpush.msra.mxu0 %v33_v9  ;;  %109 = vmatpush.msra.mxu1 %v33_v9 }
  0x14   :  { %51 = vmatpush.msra.mxu0 %v32_v10  ;;  %110 = vmatpush.msra.mxu1 %v32_v10 }
  0x16   :  { %52 = vmatpush.msra.mxu0 %v31_v11  ;;  %111 = vmatpush.msra.mxu1 %v31_v11 }
  0x18   :  { %53 = vmatpush.msra.mxu0 %v30_v12  ;;  %112 = vmatpush.msra.mxu1 %v30_v12 }
  0x1a   :  { %54 = vmatpush.msra.mxu0 %v29_v13  ;;  %113 = vmatpush.msra.mxu1 %v29_v13 }
  0x1c   :  { %55 = vmatpush.msra.mxu0 %v28_v14  ;;  %114 = vmatpush.msra.mxu1 %v28_v14 }
  0x1e   :  { %56 = vmatpush.msra.mxu0 %v27_v15  ;;  %115 = vmatpush.msra.mxu1 %v27_v15 }
  0x20   :  { %57 = vmatpush.msra.mxu0 %v26_v16  ;;  %116 = vmatpush.msra.mxu1 %v26_v16 }
  0x21   :  { %58 = vmatmul.f32.vlgmr.msra.gmra.mxu0 %v24_v17  ;;  %61 = vmatmul.f32.vlgmr.msra.gmra.mxu1 %v25_v18 }
  0x9e   :  { %v59_v21 = vpop.f32.mrf.mxu0  ;;  %v62_v22 = vpop.f32.mrf.mxu1 }
  0x9f   :  { %v65_v23 = vadd.f32 %v59_v21, %v22_v19  ;;  %v66_v24 = vadd.f32 %v62_v22, %v23_v20 }
  0xa1   :  { %68 = vst.msk [vmem:[#allocation2] sm:$0xff] %vm19_vm0, %v65_v23 }
  0xa2   :  { %69 = vst.msk [vmem:[#allocation2 + $0x8] sm:$0xff] %vm19_vm0, %v66_v24 }
  0xa8   :  { %v73_v26 = vld [vmem:[#allocation2] sm:$0xff] }
  0xa9   :  { %v74_v27 = vld [vmem:[#allocation2 + $0x8] sm:$0xff]  ;;  %v79_v28 = vadd.f32 %v121_v25, %v73_v26 }
  0xaa   :  { %v80_v29 = vadd.f32 %v121_v25, %v74_v27 }
  0xab   :  { %81 = vst.msk [vmem:[#allocation3] sm:$0xff] %vm19_vm0, %v79_v28 }
  0xac   :  { %82 = vst.msk [vmem:[#allocation3 + $0x8] sm:$0xff] %vm19_vm0, %v80_v29 }
  0xad   :  { %95 = dma.vmem_to_hbm [thread:$0]  %s88_s0, 256, %s90_s25, [#allocation4], %s150_s26, %s150_s26, %s151_s27  }
  0xae   :  { %146 = dma.done.wait [#allocation4], 256  }
  0xaf   :  { %147 = vsyncadd [#allocation4], 4294967040 }
  0xb0   :  { %100 = vsyncpa [#allocation4], 1 }

// kernel: multihead_attention.3
= control target key start
LH: loop header
LB: loop body
LE: loop exit
PB: predicated region body
PF: predicated region fallthrough
CT: control target
= control target key end

     0   :  { %8 = vsyncpa [#allocation4], 0  ;;  %s326_s0 = inlined_call_operand.hbm [shape: f32[16,32], index: 0, kind: input, shape index: {}]   ;;  %s327_s1 = inlined_call_operand.hbm [shape: f32[32,384], index: 1, kind: input, shape index: {}]   ;;  %s328_s2 = inlined_call_operand.vmem [shape: f32[1,384], index: 2, kind: input, shape index: {}]   ;;  %s329_s3 = inlined_call_operand.vmem [shape: f32[16,384], index: 3, kind: output, shape index: {}]  }
   0x1   :  { %s14_s14 = sshll.u32 %s326_s0, 4  ;;  %s15_s14 = int_to_ptr.hbm [resolvable:$true] %s14_s14 }
   0x2   :  { %9 = vsyncpa [#allocation6], 0  ;;  %s267_s15 = smov [#allocation3]   ;;  %s27_s19 = sshll.u32 %s327_s1, 4  ;;  %s28_s19 = int_to_ptr.hbm [resolvable:$true] %s27_s19 }
   0x3   :  { %s16_s16 = sshll.u32 %s267_s15, 4  ;;  %s268_s20 = smov 128   ;;  %s17_s16 = int_to_ptr.vmem [resolvable:$true] %s16_s16 }
   0x4   :  { %s269_s21 = smov 8   ;;  %s270_s22 = smov [#allocation5]  }
   0x5   :  { %22 = dma.hbm_to_vmem [thread:$0]  %s15_s14, 256, %s17_s16, [#allocation4], %s268_s20, %s268_s20, %s269_s21  }
   0x6   :  { %s29_s23 = sshll.u32 %s270_s22, 4  ;;  %s271_s24 = smov 384   ;;  %s30_s23 = int_to_ptr.vmem [resolvable:$true] %s29_s23 }
   0x7   :  { %s272_s25 = smov 24  }
   0x8   :  { %35 = dma.hbm_to_vmem [thread:$0]  %s28_s19, 1536, %s30_s23, [#allocation6], %s271_s24, %s271_s24, %s272_s25  }
   0x9   :  { %263 = dma.done.wait [#allocation4], 256  }
   0xa   :  { %264 = vsyncadd [#allocation4], 4294967040 }
   0xb   :  { %265 = dma.done.wait [#allocation6], 1536  }
   0xc   :  { %266 = vsyncadd [#allocation6], 4294965760  ;;  %v75_v0 = vld [vmem:[#allocation5 + $0x58] sm:$0xff]  ;;  %v72_v1 = vld [vmem:[#allocation5 + $0x40] sm:$0xff]  ;;  %vm76_vm0 = vcmask 261120  }
   0xd   :  { %141 = vmatpush.msra.mxu2 %v75_v0  ;;  %v69_v2 = vld [vmem:[#allocation5 + $0x28] sm:$0xff]  ;;  %v74_v3 = vld [vmem:[#allocation5 + $0x50] sm:$0xff]  ;;  %v71_v5 = vld [vmem:[#allocation5 + $0x38] sm:$0xff] }
   0xe   :  { %118 = vmatpush.msra.mxu1 %v74_v3  ;;  %v73_v4 = vld [vmem:[#allocation5 + $0x48] sm:$0xff]  ;;  %v70_v6 = vld [vmem:[#allocation5 + $0x30] sm:$0xff]  ;;  %v68_v7 = vld [vmem:[#allocation5 + $0x20] sm:$0xff] }
   0xf   :  { %142 = vmatpush.msra.mxu2 %v72_v1  ;;  %205 = vmatpush.msra.mxu3 %v73_v4  ;;  %v66_v8 = vld [vmem:[#allocation5 + $0x10] sm:$0xff]  ;;  %v67_v9 = vld [vmem:[#allocation5 + $0x18] sm:$0xff]  ;;  %v65_v11 = vld [vmem:[#allocation5 + $0x8] sm:$0xff] }
  0x10   :  { %119 = vmatpush.msra.mxu1 %v71_v5  ;;  %95 = vmatpush.msra.mxu0 %v73_v4  ;;  %v62_v10 = vld [vmem:[#allocation3] sm:$0xff]  ;;  %v64_v12 = vld [vmem:[#allocation5] sm:$0xff]  ;;  %v63_v13 = vld [vmem:[#allocation3 + $0x8] sm:$0xff] }
  0x11   :  { %143 = vmatpush.msra.mxu2 %v69_v2  ;;  %206 = vmatpush.msra.mxu3 %v70_v6  ;;  %v173_v14 = vld [vmem:[%s328_s2] sm:$0x7] }
  0x12   :  { %120 = vmatpush.msra.mxu1 %v68_v7  ;;  %96 = vmatpush.msra.mxu0 %v70_v6  ;;  %v176_v15 = vperm.slane %v173_v14, 1  ;;  %v175_v18 = vperm.slane %v173_v14, 0  ;;  %v177_v19 = vperm.slane %v173_v14, 2 }
  0x13   :  { %144 = vmatpush.msra.mxu2 %v66_v8  ;;  %207 = vmatpush.msra.mxu3 %v67_v9 }
  0x14   :  { %203 = vmatmul.msk.f32.vlgmr.msra.gmra.mxu2 %vm76_vm0, %v62_v10  ;;  %121 = vmatpush.msra.mxu1 %v65_v11 }
  0x15   :  { %201 = vmatmul.msk.f32.vlgmr.msra.gmra.mxu1 %vm76_vm0, %v62_v10  ;;  %208 = vmatpush.msra.mxu3 %v64_v12 }
  0x16   :  { %200 = vmatmul.msk.f32.vlgmr.msra.gmra.mxu3 %vm76_vm0, %v63_v13  ;;  %97 = vmatpush.msra.mxu0 %v67_v9 }
  0x18   :  { %98 = vmatpush.msra.mxu0 %v64_v12 }
  0x19   :  { %199 = vmatmul.msk.f32.vlgmr.msra.gmra.mxu0 %vm76_vm0, %v62_v10 }
  0x1c   :  { %204 = vmatmul.msk.f32.gmra.mxu2 %vm76_vm0, %v63_v13 }
  0x1d   :  { %202 = vmatmul.msk.f32.gmra.mxu1 %vm76_vm0, %v63_v13 }
  0x92   :  { %v123_v16 = vpop.f32.mrf.mxu1 }
  0x93   :  { %v182_v17 = vadd.f32 %v176_v15, %v123_v16 }
  0x95   :  { %188 = vst [vmem:[%s329_s3 + $0x8] sm:$0xff] %v182_v17 }
  0x96   :  { %v100_v20 = vpop.f32.mrf.mxu0 }
  0x97   :  { %v146_v21 = vpop.f32.mrf.mxu2  ;;  %v181_v22 = vadd.f32 %v175_v18, %v100_v20 }
  0x98   :  { %v183_v23 = vadd.f32 %v177_v19, %v146_v21 }
  0x99   :  { %187 = vst [vmem:[%s329_s3] sm:$0xff] %v181_v22  ;;  %v103_v24 = vpop.f32.mrf.mxu3 }
  0x9a   :  { %189 = vst [vmem:[%s329_s3 + $0x10] sm:$0xff] %v183_v23  ;;  %v184_v25 = vadd.f32 %v175_v18, %v103_v24  ;;  %v126_v26 = vpop.f32.mrf.mxu1 }
  0x9b   :  { %v185_v27 = vadd.f32 %v176_v15, %v126_v26 }
  0x9c   :  { %190 = vst [vmem:[%s329_s3 + $0x18] sm:$0xff] %v184_v25 }
  0x9d   :  { %191 = vst [vmem:[%s329_s3 + $0x20] sm:$0xff] %v185_v27 }
  0x9f   :  { %v149_v28 = vpop.f32.mrf.mxu2 }
  0xa0   :  { %v186_v29 = vadd.f32 %v177_v19, %v149_v28 }
  0xa2   :  { %192 = vst [vmem:[%s329_s3 + $0x28] sm:$0xff] %v186_v29 }
  0xa3   :  { %197 = vsyncpa [#allocation4], 1 }
  0xa4   :  { %198 = vsyncpa [#allocation6], 1 }

// kernel: multihead_attention.4
= control target key start
LH: loop header
LB: loop body
LE: loop exit
PB: predicated region body
PF: predicated region fallthrough
CT: control target
= control target key end

     0   :  { %vm67_vm0 = vcmask 64512   ;;  %s1044_s24 = smov 16   ;;  %s1045_s25 = smov 24   ;;  %vm848_vm1 = vcmask 130048   ;;  %vm857_vm2 = vcmask 195584   ;;  %vm866_vm3 = vcmask 261120   ;;  %s1503_s1 = inlined_call_operand.vmem [shape: f32[2,8,384], index: 1, kind: input, shape index: {}]   ;;  %s1504_s0 = inlined_call_operand.vmem [shape: f32[128,128], index: 0, kind: input, shape index: {}]   ;;  %s1505_s2 = inlined_call_operand.vmem [shape: f32[2,32,32], index: 2, kind: output, shape index: {}]  }
   0x1   :  { %v11_v0 = vld [vmem:[%s1503_s1] sm:$0xff]  ;;  %v12_v2 = vld [vmem:[%s1503_s1 + $0x8] sm:$0xff]  ;;  %v14_v3 = vld [vmem:[%s1503_s1 + $0x18] sm:$0xff] }
   0x2   :  { %v33_v1 = vmul.f32 0.35355338, %v11_v0  ;;  %131 = vmatpush.msra.mxu0 %v12_v2  ;;  %v34_v4 = vmul.f32 0.35355338, %v14_v3  ;;  %v15_v17 = vld [vmem:[%s1503_s1 + $0x20] sm:$0xff]  ;;  %v18_v26 = vld [vmem:[%s1504_s0 + $0x8] sm:$0xff] }
   0x3   :  { %276 = vmatpush.msra.mxu1 %v15_v17  ;;  %v17_v22 = vld [vmem:[%s1504_s0] sm:$0xff]  ;;  %v19_v45 = vld [vmem:[%s1504_s0 + $0x10] sm:$0xff]  ;;  %v20_v51 = vld [vmem:[%s1504_s0 + $0x18] sm:$0xff] }
   0x4   :  { %35 = vxpose.xlu0.b32.start.end [1/1] (short) %v33_v1, 128  ;;  %v21_v57 = vld [vmem:[%s1504_s0 + $0x20] sm:$0xff]  ;;  %v22_v63 = vld [vmem:[%s1504_s0 + $0x28] sm:$0xff]  ;;  %v23_v3 = vld [vmem:[%s1504_s0 + $0x30] sm:$0xff] }
  0x84   :  { %181 = vxpose.xlu0.b32.start.end [1/1] (short) %v34_v4, 128 }
  0xa8   :  { %v51_v5 = vpop.trf.xlu0 }
  0xa9   :  { %879 = vmatmul.msk.f32.vlgmr.msra.gmra.mxu0 %vm67_vm0, %v51_v5 }
  0xb0   :  { %v52_v6 = vpop.trf.xlu0 }
  0xb1   :  { %880 = vmatmul.msk.f32.gmra.mxu0 %vm67_vm0, %v52_v6 }
  0xb8   :  { %v53_v7 = vpop.trf.xlu0 }
  0xb9   :  { %881 = vmatmul.msk.f32.gmra.mxu0 %vm67_vm0, %v53_v7 }
  0xc0   :  { %v54_v8 = vpop.trf.xlu0 }
  0xc1   :  { %882 = vmatmul.msk.f32.gmra.mxu0 %vm67_vm0, %v54_v8  ;;  %v24_v8 = vld [vmem:[%s1504_s0 + $0x38] sm:$0xff] }
  0xc8   :  { %v55_v9 = vpop.trf.xlu0 }
  0xc9   :  { %883 = vmatmul.msk.f32.gmra.mxu0 %vm67_vm0, %v55_v9 }
  0xd0   :  { %v56_v10 = vpop.trf.xlu0 }
  0xd1   :  { %884 = vmatmul.msk.f32.gmra.mxu0 %vm67_vm0, %v56_v10 }
  0xd8   :  { %v57_v11 = vpop.trf.xlu0 }
  0xd9   :  { %885 = vmatmul.msk.f32.gmra.mxu0 %vm67_vm0, %v57_v11 }
  0xe0   :  { %v58_v12 = vpop.trf.xlu0 }
  0xe1   :  { %886 = vmatmul.msk.f32.gmra.mxu0 %vm67_vm0, %v58_v12 }
  0xe8   :  { %v59_v13 = vpop.trf.xlu0 }
  0xe9   :  { %887 = vmatmul.msk.f32.gmra.mxu0 %vm67_vm0, %v59_v13  ;;  %v25_v13 = vld [vmem:[%s1504_s0 + $0x40] sm:$0xff] }
  0xf0   :  { %v60_v14 = vpop.trf.xlu0 }
  0xf1   :  { %888 = vmatmul.msk.f32.gmra.mxu0 %vm67_vm0, %v60_v14 }
  0xf8   :  { %v61_v15 = vpop.trf.xlu0 }
  0xf9   :  { %889 = vmatmul.msk.f32.gmra.mxu0 %vm67_vm0, %v61_v15 }
 0x100   :  { %v62_v16 = vpop.trf.xlu0 }
 0x101   :  { %890 = vmatmul.msk.f32.gmra.mxu0 %vm67_vm0, %v62_v16 }
 0x108   :  { %v63_v18 = vpop.trf.xlu0 }
 0x109   :  { %891 = vmatmul.msk.f32.gmra.mxu0 %vm67_vm0, %v63_v18  ;;  %v26_v18 = vld [vmem:[%s1504_s0 + $0x48] sm:$0xff] }
 0x110   :  { %v64_v19 = vpop.trf.xlu0 }
 0x111   :  { %892 = vmatmul.msk.f32.gmra.mxu0 %vm67_vm0, %v64_v19 }
 0x118   :  { %v65_v20 = vpop.trf.xlu0 }
 0x119   :  { %893 = vmatmul.msk.f32.gmra.mxu0 %vm67_vm0, %v65_v20 }
 0x120   :  { %v66_v21 = vpop.trf.xlu0 }
 0x121   :  { %894 = vmatmul.msk.f32.gmra.mxu0 %vm67_vm0, %v66_v21 }
 0x126   :  { %v133_v23 = vpop.f32.mrf.mxu0 }
 0x127   :  { %v1092_v24 = vadd.f32 %v133_v23, %v17_v22  ;;  %v27_v23 = vld [vmem:[%s1504_s0 + $0x50] sm:$0xff] }
 0x128   :  { %v197_v25 = vpop.trf.xlu0 }
 0x129   :  { %895 = vmatmul.msk.f32.vlgmr.msra.gmra.mxu1 %vm67_vm0, %v197_v25  ;;  %326 = vmax.xlane.f32.xlu1 %v1092_v24 }
 0x12e   :  { %v136_v27 = vpop.f32.mrf.mxu0 }
 0x12f   :  { %v1099_v28 = vadd.f32 %v136_v27, %v18_v26 }
 0x130   :  { %v198_v29 = vpop.trf.xlu0 }
 0x131   :  { %896 = vmatmul.msk.f32.gmra.mxu1 %vm67_vm0, %v198_v29  ;;  %328 = vmax.xlane.f32.xlu2 %v1099_v28 }
 0x136   :  { %v139_v40 = vpop.f32.mrf.mxu0 }
 0x137   :  { %v1120_v48 = vadd.f32 %v139_v40, %v19_v45 }
 0x138   :  { %v199_v30 = vpop.trf.xlu0 }
 0x139   :  { %897 = vmatmul.msk.f32.gmra.mxu1 %vm67_vm0, %v199_v30 }
 0x13e   :  { %v142_v41 = vpop.f32.mrf.mxu0 }
 0x13f   :  { %v1130_v53 = vadd.f32 %v142_v41, %v20_v51 }
 0x140   :  { %v200_v31 = vpop.trf.xlu0 }
 0x141   :  { %898 = vmatmul.msk.f32.gmra.mxu1 %vm67_vm0, %v200_v31  ;;  %v28_v31 = vld [vmem:[%s1504_s0 + $0x58] sm:$0xff] }
 0x146   :  { %v145_v46 = vpop.f32.mrf.mxu0 }
 0x147   :  { %v1140_v59 = vadd.f32 %v145_v46, %v21_v57 }
 0x148   :  { %v201_v32 = vpop.trf.xlu0 }
 0x149   :  { %899 = vmatmul.msk.f32.gmra.mxu1 %vm67_vm0, %v201_v32 }
 0x14e   :  { %v148_v56 = vpop.f32.mrf.mxu0 }
 0x14f   :  { %v1150_v1 = vadd.f32 %v148_v56, %v22_v63 }
 0x150   :  { %v202_v33 = vpop.trf.xlu0 }
 0x151   :  { %900 = vmatmul.msk.f32.gmra.mxu1 %vm67_vm0, %v202_v33 }
 0x156   :  { %v151_v62 = vpop.f32.mrf.mxu0 }
 0x157   :  { %v1159_v6 = vadd.f32 %v151_v62, %v23_v3 }
 0x158   :  { %v203_v34 = vpop.trf.xlu0 }
 0x159   :  { %901 = vmatmul.msk.f32.gmra.mxu1 %vm67_vm0, %v203_v34 }
 0x15e   :  { %v154_v4 = vpop.f32.mrf.mxu0 }
 0x15f   :  { %v1168_v11 = vadd.f32 %v154_v4, %v24_v8 }
 0x160   :  { %v204_v35 = vpop.trf.xlu0 }
 0x161   :  { %902 = vmatmul.msk.f32.gmra.mxu1 %vm67_vm0, %v204_v35 }
 0x166   :  { %v157_v9 = vpop.f32.mrf.mxu0 }
 0x167   :  { %v1177_v15 = vadd.f32 %v157_v9, %v25_v13 }
 0x168   :  { %v205_v36 = vpop.trf.xlu0 }
 0x169   :  { %903 = vmatmul.msk.f32.gmra.mxu1 %vm67_vm0, %v205_v36 }
 0x16e   :  { %v160_v17 = vpop.f32.mrf.mxu0 }
 0x16f   :  { %v1186_v20 = vadd.f32 %v160_v17, %v26_v18 }
 0x170   :  { %v206_v37 = vpop.trf.xlu0 }
 0x171   :  { %904 = vmatmul.msk.f32.gmra.mxu1 %vm67_vm0, %v206_v37 }
 0x178   :  { %v207_v38 = vpop.trf.xlu0 }
 0x179   :  { %905 = vmatmul.msk.f32.gmra.mxu1 %vm67_vm0, %v207_v38 }
 0x180   :  { %v208_v39 = vpop.trf.xlu0 }
 0x181   :  { %906 = vmatmul.msk.f32.gmra.mxu1 %vm67_vm0, %v208_v39 }
 0x188   :  { %v209_v44 = vpop.trf.xlu0 }
 0x189   :  { %907 = vmatmul.msk.f32.gmra.mxu1 %vm67_vm0, %v209_v44 }
 0x190   :  { %v210_v50 = vpop.trf.xlu0 }
 0x191   :  { %908 = vmatmul.msk.f32.gmra.mxu1 %vm67_vm0, %v210_v50 }
 0x198   :  { %v211_v55 = vpop.trf.xlu0 }
 0x199   :  { %909 = vmatmul.msk.f32.gmra.mxu1 %vm67_vm0, %v211_v55 }
 0x19c   :  { %v327_v27 = vpop.xlane.xlu1 %326 }
 0x19d   :  { %v390_v30 = vsub.f32 %v1092_v24, %v327_v27 }
 0x19f   :  { %v422_v33 = vmul.f32 1.442695, %v390_v30 }
 0x1a0   :  { %v212_v61 = vpop.trf.xlu0 }
 0x1a1   :  { %910 = vmatmul.msk.f32.gmra.mxu1 %vm67_vm0, %v212_v61  ;;  %915 = vpow2.f32 %v422_v33  ;;  %v30_v33 = vld [vmem:[%s1504_s0 + $0x68] sm:$0xff] }
 0x1a4   :  { %v329_v36 = vpop.xlane.xlu2 %328 }
 0x1a5   :  { %v391_v38 = vsub.f32 %v1099_v28, %v329_v36 }
 0x1a6   :  { %v278_v42 = vpop.f32.mrf.mxu1 }
 0x1a7   :  { %v1113_v43 = vadd.f32 %v278_v42, %v17_v22  ;;  %v163_v22 = vpop.f32.mrf.mxu0  ;;  %v424_v24 = vmul.f32 1.442695, %v391_v38  ;;  %v1214_v41 = vpop.eup %915 }
 0x1a9   :  { %358 = vmax.xlane.f32.xlu1 %v1113_v43  ;;  %917 = vpow2.f32 %v424_v24 }
 0x1ae   :  { %v281_v47 = vpop.f32.mrf.mxu1 }
 0x1af   :  { %v1122_v49 = vadd.f32 %v281_v47, %v18_v26  ;;  %v1195_v26 = vadd.f32 %v163_v22, %v27_v23  ;;  %v166_v32 = vpop.f32.mrf.mxu0  ;;  %v1218_v42 = vpop.eup %917 }
 0x1b0   :  { %v1205_v35 = vadd.f32 %v166_v32, %v28_v31 }
 0x1b1   :  { %360 = vmax.xlane.f32.xlu2 %v1122_v49  ;;  %330 = vmax.xlane.f32.xlu1 %v1120_v48 }
 0x1b6   :  { %v284_v52 = vpop.f32.mrf.mxu1 }
 0x1b7   :  { %v1132_v54 = vadd.f32 %v284_v52, %v19_v45 }
 0x1b9   :  { %362 = vmax.xlane.f32.xlu2 %v1132_v54  ;;  %332 = vmax.xlane.f32.xlu1 %v1130_v53 }
 0x1be   :  { %v287_v58 = vpop.f32.mrf.mxu1 }
 0x1bf   :  { %v1142_v60 = vadd.f32 %v287_v58, %v20_v51 }
 0x1c1   :  { %364 = vmax.xlane.f32.xlu2 %v1142_v60  ;;  %334 = vmax.xlane.f32.xlu1 %v1140_v59 }
 0x1c6   :  { %v290_v0 = vpop.f32.mrf.mxu1 }
 0x1c7   :  { %v1152_v2 = vadd.f32 %v290_v0, %v21_v57 }
 0x1c9   :  { %366 = vmax.xlane.f32.xlu2 %v1152_v2  ;;  %336 = vmax.xlane.f32.xlu1 %v1150_v1 }
 0x1ce   :  { %v293_v5 = vpop.f32.mrf.mxu1 }
 0x1cf   :  { %v1161_v7 = vadd.f32 %v293_v5, %v22_v63 }
 0x1d1   :  { %368 = vmax.xlane.f32.xlu2 %v1161_v7  ;;  %338 = vmax.xlane.f32.xlu1 %v1159_v6 }
 0x1d6   :  { %v296_v10 = vpop.f32.mrf.mxu1 }
 0x1d7   :  { %v1170_v12 = vadd.f32 %v296_v10, %v23_v3 }
 0x1d9   :  { %370 = vmax.xlane.f32.xlu2 %v1170_v12  ;;  %340 = vmax.xlane.f32.xlu1 %v1168_v11 }
 0x1de   :  { %v299_v14 = vpop.f32.mrf.mxu1 }
 0x1df   :  { %v1179_v16 = vadd.f32 %v299_v14, %v24_v8 }
 0x1e1   :  { %372 = vmax.xlane.f32.xlu2 %v1179_v16  ;;  %342 = vmax.xlane.f32.xlu1 %v1177_v15 }
 0x1e6   :  { %v302_v19 = vpop.f32.mrf.mxu1 }
 0x1e7   :  { %v1188_v21 = vadd.f32 %v302_v19, %v25_v13 }
 0x1e9   :  { %374 = vmax.xlane.f32.xlu2 %v1188_v21  ;;  %344 = vmax.xlane.f32.xlu1 %v1186_v20 }
 0x1ee   :  { %v305_v25 = vpop.f32.mrf.mxu1 }
 0x1ef   :  { %v1197_v29 = vadd.f32 %v305_v25, %v26_v18 }
 0x1f1   :  { %376 = vmax.xlane.f32.xlu2 %v1197_v29  ;;  %346 = vmax.xlane.f32.xlu1 %v1195_v26 }
 0x1f6   :  { %v308_v34 = vpop.f32.mrf.mxu1 }
 0x1f7   :  { %v1207_v37 = vadd.f32 %v308_v34, %v27_v23  ;;  %v29_v23 = vld [vmem:[%s1504_s0 + $0x60] sm:$0xff] }
 0x1f9   :  { %378 = vmax.xlane.f32.xlu2 %v1207_v37  ;;  %348 = vmax.xlane.f32.xlu1 %v1205_v35 }
 0x1fe   :  { %v311_v39 = vpop.f32.mrf.mxu1 }
 0x1ff   :  { %v1212_v40 = vadd.f32 %v311_v39, %v28_v31 }
 0x201   :  { %380 = vmax.xlane.f32.xlu2 %v1212_v40  ;;  %486 = vadd.xlane.f32.xlu1 %v1214_v41 }
 0x206   :  { %v314_v10 = vpop.f32.mrf.mxu1 }
 0x207   :  { %v1254_v27 = vadd.f32 %v314_v10, %v29_v23 }
 0x209   :  { %488 = vadd.xlane.f32.xlu1 %v1218_v42 }
 0x21c   :  { %v359_v44 = vpop.xlane.xlu1 %358 }
 0x21d   :  { %v406_v45 = vsub.f32 %v1113_v43, %v359_v44  ;;  %v31_v44 = vld [vmem:[%s1504_s0 + $0x70] sm:$0xff] }
 0x21f   :  { %v454_v46 = vmul.f32 1.442695, %v406_v45 }
 0x221   :  { %919 = vpow2.f32 %v454_v46 }
 0x224   :  { %v361_v28 = vpop.xlane.xlu2 %360  ;;  %v331_v47 = vpop.xlane.xlu1 %330 }
 0x225   :  { %v407_v50 = vsub.f32 %v1122_v49, %v361_v28  ;;  %v392_v51 = vsub.f32 %v1120_v48, %v331_v47 }
 0x227   :  { %v1224_v52 = vpop.eup %919  ;;  %v456_v55 = vmul.f32 1.442695, %v407_v50  ;;  %v426_v56 = vmul.f32 1.442695, %v392_v51  ;;  %v13_v51 = vld [vmem:[%s1503_s1 + $0x10] sm:$0xff] }
 0x228   :  { %518 = vadd.xlane.f32.xlu2 %v1224_v52  ;;  %629 = vmatpush.xpose.msra.mxu2 %v13_v51 }
 0x229   :  { %921 = vpow2.f32 %v456_v55 }
 0x22a   :  { %923 = vpow2.f32 %v426_v56 }
 0x22c   :  { %v363_v57 = vpop.xlane.xlu2 %362  ;;  %v333_v58 = vpop.xlane.xlu1 %332 }
 0x22d   :  { %v408_v43 = vsub.f32 %v1132_v54, %v363_v57  ;;  %v393_v61 = vsub.f32 %v1130_v53, %v333_v58  ;;  %v32_v57 = vld [vmem:[%s1504_s0 + $0x78] sm:$0xff] }
 0x22f   :  { %v1229_v62 = vpop.eup %921  ;;  %v458_v63 = vmul.f32 1.442695, %v408_v43  ;;  %v428_v49 = vmul.f32 1.442695, %v393_v61 }
 0x230   :  { %v1231_v0 = vpop.eup %923  ;;  %520 = vadd.xlane.f32.xlu2 %v1229_v62 }
 0x231   :  { %925 = vpow2.f32 %v458_v63  ;;  %490 = vadd.xlane.f32.xlu1 %v1231_v0 }
 0x232   :  { %927 = vpow2.f32 %v428_v49 }
 0x234   :  { %v365_v48 = vpop.xlane.xlu2 %364  ;;  %v335_v3 = vpop.xlane.xlu1 %334 }
 0x235   :  { %v409_v4 = vsub.f32 %v1142_v60, %v365_v48  ;;  %v394_v54 = vsub.f32 %v1140_v59, %v335_v3 }
 0x237   :  { %v1237_v5 = vpop.eup %925  ;;  %v460_v53 = vmul.f32 1.442695, %v409_v4  ;;  %v430_v8 = vmul.f32 1.442695, %v394_v54 }
 0x238   :  { %v1239_v9 = vpop.eup %927  ;;  %522 = vadd.xlane.f32.xlu2 %v1237_v5 }
 0x239   :  { %929 = vpow2.f32 %v460_v53  ;;  %492 = vadd.xlane.f32.xlu1 %v1239_v9 }
 0x23a   :  { %931 = vpow2.f32 %v430_v8 }
 0x23c   :  { %v367_v13 = vpop.xlane.xlu2 %366  ;;  %v337_v14 = vpop.xlane.xlu1 %336 }
 0x23d   :  { %v410_v17 = vsub.f32 %v1152_v2, %v367_v13  ;;  %v395_v60 = vsub.f32 %v1150_v1, %v337_v14  ;;  %v169_v2 = vpop.f32.mrf.mxu0  ;;  %v317_v1 = vpop.f32.mrf.mxu1 }
 0x23e   :  { %v1266_v36 = vadd.f32 %v317_v1, %v30_v33  ;;  %v1268_v38 = vadd.f32 %v169_v2, %v29_v23 }
 0x23f   :  { %v1245_v59 = vpop.eup %929  ;;  %v462_v18 = vmul.f32 1.442695, %v410_v17  ;;  %v432_v19 = vmul.f32 1.442695, %v395_v60 }
 0x240   :  { %v1247_v22 = vpop.eup %931  ;;  %524 = vadd.xlane.f32.xlu2 %v1245_v59 }
 0x241   :  { %933 = vpow2.f32 %v462_v18  ;;  %494 = vadd.xlane.f32.xlu1 %v1247_v22 }
 0x242   :  { %935 = vpow2.f32 %v432_v19 }
 0x244   :  { %v339_v25 = vpop.xlane.xlu1 %338  ;;  %v369_v32 = vpop.xlane.xlu2 %368 }
 0x245   :  { %v172_v24 = vpop.f32.mrf.mxu0  ;;  %v320_v39 = vpop.f32.mrf.mxu1  ;;  %v411_v55 = vsub.f32 %v1161_v7, %v369_v32  ;;  %v396_v48 = vsub.f32 %v1159_v6, %v339_v25 }
 0x246   :  { %v1275_v28 = vadd.f32 %v320_v39, %v31_v44  ;;  %v1277_v47 = vadd.f32 %v172_v24, %v30_v33 }
 0x247   :  { %v1256_v30 = vpop.eup %933  ;;  %v464_v63 = vmul.f32 1.442695, %v411_v55  ;;  %v434_v54 = vmul.f32 1.442695, %v396_v48 }
 0x248   :  { %v1258_v31 = vpop.eup %935  ;;  %526 = vadd.xlane.f32.xlu2 %v1256_v30 }
 0x249   :  { %382 = vmax.xlane.f32.xlu1 %v1254_v27  ;;  %496 = vadd.xlane.f32.xlu0 %v1258_v31  ;;  %937 = vpow2.f32 %v464_v63 }
 0x24a   :  { %939 = vpow2.f32 %v434_v54 }
 0x24c   :  { %v341_v34 = vpop.xlane.xlu1 %340  ;;  %v371_v46 = vpop.xlane.xlu2 %370 }
 0x24d   :  { %v175_v50 = vpop.f32.mrf.mxu0  ;;  %v323_v56 = vpop.f32.mrf.mxu1  ;;  %v412_v7 = vsub.f32 %v1170_v12, %v371_v46  ;;  %v397_v13 = vsub.f32 %v1168_v11, %v341_v34 }
 0x24e   :  { %v1288_v43 = vadd.f32 %v323_v56, %v32_v57  ;;  %v1290_v61 = vadd.f32 %v175_v50, %v31_v44  ;;  %v16_v44 = vld [vmem:[%s1503_s1 + $0x28] sm:$0xff]  ;;  %s1043_s1 = smov 8  }
 0x24f   :  { %v466_v8 = vmul.f32 1.442695, %v412_v7  ;;  %v1298_v10 = vpop.eup %937  ;;  %v436_v17 = vmul.f32 1.442695, %v397_v13  ;;  %694 = vmatpush.xpose.msra.mxu3 %v16_v44 }
 0x250   :  { %350 = vmax.xlane.f32.xlu2 %v1268_v38  ;;  %v1304_v18 = vpop.eup %939 }
 0x251   :  { %384 = vmax.xlane.f32.xlu1 %v1266_v36  ;;  %941 = vpow2.f32 %v466_v8 }
 0x252   :  { %943 = vpow2.f32 %v436_v17 }
 0x254   :  { %v343_v45 = vpop.xlane.xlu1 %342  ;;  %v373_v49 = vpop.xlane.xlu2 %372 }
 0x255   :  { %v178_v3 = vpop.f32.mrf.mxu0  ;;  %v413_v6 = vsub.f32 %v1179_v16, %v373_v49  ;;  %v398_v23 = vsub.f32 %v1177_v15, %v343_v45 }
 0x256   :  { %v1296_v53 = vadd.f32 %v178_v3, %v32_v57 }
 0x257   :  { %v468_v60 = vmul.f32 1.442695, %v413_v6  ;;  %v1306_v19 = vpop.eup %941  ;;  %v438_v16 = vmul.f32 1.442695, %v398_v23 }
 0x258   :  { %352 = vmax.xlane.f32.xlu2 %v1277_v47  ;;  %v1312_v32 = vpop.eup %943 }
 0x259   :  { %386 = vmax.xlane.f32.xlu1 %v1275_v28  ;;  %945 = vpow2.f32 %v468_v60 }
 0x25c   :  { %v345_v58 = vpop.xlane.xlu1 %344  ;;  %v375_v14 = vpop.xlane.xlu2 %374 }
 0x25d   :  { %v414_v11 = vsub.f32 %v1188_v21, %v375_v14  ;;  %v399_v34 = vsub.f32 %v1186_v20, %v345_v58 }
 0x25f   :  { %v470_v1 = vmul.f32 1.442695, %v414_v11  ;;  %v1314_v33 = vpop.eup %945  ;;  %v440_v45 = vmul.f32 1.442695, %v399_v34 }
 0x260   :  { %354 = vmax.xlane.f32.xlu2 %v1290_v61 }
 0x261   :  { %388 = vmax.xlane.f32.xlu1 %v1288_v43 }
 0x264   :  { %v347_v4 = vpop.xlane.xlu1 %346  ;;  %v377_v25 = vpop.xlane.xlu2 %376 }
 0x265   :  { %v415_v15 = vsub.f32 %v1197_v29, %v377_v25  ;;  %v400_v29 = vsub.f32 %v1195_v26, %v347_v4 }
 0x267   :  { %v472_v50 = vmul.f32 1.442695, %v415_v15  ;;  %v442_v57 = vmul.f32 1.442695, %v400_v29 }
 0x268   :  { %356 = vmax.xlane.f32.xlu2 %v1296_v53 }
 0x269   :  { %528 = vadd.xlane.f32.xlu1 %v1298_v10 }
 0x26c   :  { %v349_v12 = vpop.xlane.xlu1 %348  ;;  %v379_v46 = vpop.xlane.xlu2 %378 }
 0x26d   :  { %v401_v26 = vsub.f32 %v1205_v35, %v349_v12 }
 0x26f   :  { %v444_v7 = vmul.f32 1.442695, %v401_v26 }
 0x270   :  { %498 = vadd.xlane.f32.xlu2 %v1304_v18 }
 0x271   :  { %530 = vadd.xlane.f32.xlu1 %v1306_v19 }
 0x274   :  { %v487_v2 = vpop.xlane.xlu1 %486  ;;  %v381_v49 = vpop.xlane.xlu2 %380 }
 0x275   :  { %947 = vrcp.f32 %v487_v2 }
 0x276   :  { %949 = vpow2.f32 %v438_v16 }
 0x277   :  { %951 = vpow2.f32 %v470_v1 }
 0x278   :  { %500 = vadd.xlane.f32.xlu2 %v1312_v32 }
 0x279   :  { %532 = vadd.xlane.f32.xlu1 %v1314_v33 }
 0x27b   :  { %v948_v21 = vpop.eup %947 }
 0x27c   :  { %v489_v24 = vpop.xlane.xlu1 %488  ;;  %v582_v39 = vmul.f32 %v948_v21, %v1214_v41  ;;  %v1324_v20 = vpop.eup %949  ;;  %v416_v41 = vsub.f32 %v1207_v37, %v379_v46  ;;  %v417_v37 = vsub.f32 %v1212_v40, %v381_v49 }
 0x27d   :  { %953 = vrcp.f32 %v489_v24  ;;  %v1326_v51 = vpop.eup %951 }
 0x27e   :  { %630 = vmatmul.f32.vlgmr.msra.gmra.mxu2 %v582_v39  ;;  %955 = vpow2.f32 %v440_v45  ;;  %v474_v58 = vmul.f32 1.442695, %v416_v41 }
 0x27f   :  { %957 = vpow2.f32 %v472_v50 }
 0x280   :  { %502 = vadd.xlane.f32.xlu2 %v1324_v20  ;;  %959 = vpow2.f32 %v442_v57 }
 0x281   :  { %534 = vadd.xlane.f32.xlu1 %v1326_v51  ;;  %961 = vpow2.f32 %v474_v58 }
 0x282   :  { %963 = vpow2.f32 %v444_v7 }
 0x283   :  { %v954_v55 = vpop.eup %953 }
 0x284   :  { %v583_v56 = vmul.f32 %v954_v55, %v1218_v42  ;;  %v1333_v63 = vpop.eup %955  ;;  %v476_v42 = vmul.f32 1.442695, %v417_v37 }
 0x285   :  { %v1335_v48 = vpop.eup %957 }
 0x286   :  { %633 = vmatmul.f32.gmra.mxu2 %v583_v56  ;;  %v1341_v3 = vpop.eup %959  ;;  %965 = vpow2.f32 %v476_v42 }
 0x287   :  { %v1343_v4 = vpop.eup %961 }
 0x288   :  { %504 = vadd.xlane.f32.xlu2 %v1333_v63  ;;  %v1347_v54 = vpop.eup %963 }
 0x289   :  { %536 = vadd.xlane.f32.xlu1 %v1335_v48 }
 0x28c   :  { %v1349_v35 = vpop.eup %965 }
 0x290   :  { %506 = vadd.xlane.f32.xlu2 %v1341_v3 }
 0x291   :  { %538 = vadd.xlane.f32.xlu1 %v1343_v4 }
 0x298   :  { %508 = vadd.xlane.f32.xlu2 %v1347_v54 }
 0x299   :  { %540 = vadd.xlane.f32.xlu1 %v1349_v35 }
 0x29b   :  { %v519_v40 = vpop.xlane.xlu2 %518 }
 0x29c   :  { %967 = vrcp.f32 %v519_v40 }
 0x2a2   :  { %v968_v8 = vpop.eup %967 }
 0x2a3   :  { %v521_v13 = vpop.xlane.xlu2 %520  ;;  %v598_v14 = vmul.f32 %v968_v8, %v1224_v52 }
 0x2a4   :  { %969 = vrcp.f32 %v521_v13  ;;  %v491_v6 = vpop.xlane.xlu1 %490 }
 0x2a5   :  { %971 = vrcp.f32 %v491_v6  ;;  %695 = vmatmul.f32.vlgmr.msra.gmra.mxu3 %v598_v14 }
 0x2aa   :  { %v970_v12 = vpop.eup %969 }
 0x2ab   :  { %v972_v17 = vpop.eup %971  ;;  %v523_v60 = vpop.xlane.xlu2 %522  ;;  %v599_v23 = vmul.f32 %v970_v12, %v1229_v62 }
 0x2ac   :  { %973 = vrcp.f32 %v523_v60  ;;  %v493_v11 = vpop.xlane.xlu1 %492  ;;  %v584_v25 = vmul.f32 %v972_v17, %v1231_v0 }
 0x2ad   :  { %975 = vrcp.f32 %v493_v11  ;;  %698 = vmatmul.f32.gmra.mxu3 %v599_v23 }
 0x2ae   :  { %636 = vmatmul.f32.gmra.mxu2 %v584_v25 }
 0x2b2   :  { %v974_v2 = vpop.eup %973 }
 0x2b3   :  { %v976_v16 = vpop.eup %975  ;;  %v525_v1 = vpop.xlane.xlu2 %524  ;;  %v600_v52 = vmul.f32 %v974_v2, %v1237_v5 }
 0x2b4   :  { %977 = vrcp.f32 %v525_v1  ;;  %v495_v34 = vpop.xlane.xlu1 %494  ;;  %v585_v15 = vmul.f32 %v976_v16, %v1239_v9 }
 0x2b5   :  { %979 = vrcp.f32 %v495_v34  ;;  %701 = vmatmul.f32.gmra.mxu3 %v600_v52 }
 0x2b6   :  { %639 = vmatmul.f32.gmra.mxu2 %v585_v15 }
 0x2ba   :  { %v978_v62 = vpop.eup %977 }
 0x2bb   :  { %v980_v21 = vpop.eup %979  ;;  %v527_v24 = vpop.xlane.xlu2 %526  ;;  %v601_v0 = vmul.f32 %v978_v62, %v1245_v59 }
 0x2bc   :  { %981 = vrcp.f32 %v527_v24  ;;  %v497_v39 = vpop.xlane.xlu0 %496  ;;  %v383_v44 = vpop.xlane.xlu1 %382  ;;  %v586_v45 = vmul.f32 %v980_v21, %v1247_v22 }
 0x2bd   :  { %983 = vrcp.f32 %v497_v39  ;;  %v418_v5 = vsub.f32 %v1254_v27, %v383_v44  ;;  %704 = vmatmul.f32.gmra.mxu3 %v601_v0 }
 0x2be   :  { %642 = vmatmul.f32.gmra.mxu2 %v586_v45 }
 0x2bf   :  { %v478_v46 = vmul.f32 1.442695, %v418_v5 }
 0x2c1   :  { %985 = vpow2.f32 %v478_v46 }
 0x2c2   :  { %v982_v9 = vpop.eup %981 }
 0x2c3   :  { %v984_v50 = vpop.eup %983  ;;  %v351_v29 = vpop.xlane.xlu2 %350  ;;  %v602_v41 = vmul.f32 %v982_v9, %v1256_v30 }
 0x2c4   :  { %v402_v55 = vsub.f32 %v1268_v38, %v351_v29  ;;  %v385_v59 = vpop.xlane.xlu1 %384  ;;  %v587_v56 = vmul.f32 %v984_v50, %v1258_v31 }
 0x2c5   :  { %v419_v57 = vsub.f32 %v1266_v36, %v385_v59  ;;  %707 = vmatmul.f32.gmra.mxu3 %v602_v41 }
 0x2c6   :  { %v446_v22 = vmul.f32 1.442695, %v402_v55  ;;  %645 = vmatmul.f32.gmra.mxu2 %v587_v56 }
 0x2c7   :  { %v1365_v27 = vpop.eup %985  ;;  %v480_v58 = vmul.f32 1.442695, %v419_v57 }
 0x2c8   :  { %987 = vpow2.f32 %v446_v22  ;;  %542 = vadd.xlane.f32.xlu1 %v1365_v27 }
 0x2c9   :  { %989 = vpow2.f32 %v480_v58 }
 0x2cb   :  { %v353_v49 = vpop.xlane.xlu2 %352 }
 0x2cc   :  { %v403_v30 = vsub.f32 %v1277_v47, %v353_v49  ;;  %v387_v26 = vpop.xlane.xlu1 %386 }
 0x2cd   :  { %v420_v38 = vsub.f32 %v1275_v28, %v387_v26 }
 0x2ce   :  { %v1370_v37 = vpop.eup %987  ;;  %v448_v31 = vmul.f32 1.442695, %v403_v30 }
 0x2cf   :  { %v1372_v36 = vpop.eup %989  ;;  %v482_v7 = vmul.f32 1.442695, %v420_v38  ;;  %510 = vadd.xlane.f32.xlu2 %v1370_v37 }
 0x2d0   :  { %991 = vpow2.f32 %v448_v31  ;;  %544 = vadd.xlane.f32.xlu1 %v1372_v36 }
 0x2d1   :  { %993 = vpow2.f32 %v482_v7 }
 0x2d3   :  { %v355_v42 = vpop.xlane.xlu2 %354 }
 0x2d4   :  { %v404_v40 = vsub.f32 %v1290_v61, %v355_v42  ;;  %v389_v8 = vpop.xlane.xlu1 %388 }
 0x2d5   :  { %v421_v47 = vsub.f32 %v1288_v43, %v389_v8 }
 0x2d6   :  { %v1378_v13 = vpop.eup %991  ;;  %v450_v28 = vmul.f32 1.442695, %v404_v40 }
 0x2d7   :  { %v1380_v14 = vpop.eup %993  ;;  %v484_v6 = vmul.f32 1.442695, %v421_v47  ;;  %512 = vadd.xlane.f32.xlu2 %v1378_v13 }
 0x2d8   :  { %995 = vpow2.f32 %v450_v28  ;;  %546 = vadd.xlane.f32.xlu1 %v1380_v14 }
 0x2d9   :  { %997 = vpow2.f32 %v484_v6 }
 0x2db   :  { %v357_v12 = vpop.xlane.xlu2 %356 }
 0x2dc   :  { %v405_v17 = vsub.f32 %v1296_v53, %v357_v12  ;;  %v529_v60 = vpop.xlane.xlu1 %528 }
 0x2dd   :  { %999 = vrcp.f32 %v529_v60 }
 0x2de   :  { %v1385_v61 = vpop.eup %995  ;;  %v452_v43 = vmul.f32 1.442695, %v405_v17 }
 0x2df   :  { %v1387_v23 = vpop.eup %997  ;;  %514 = vadd.xlane.f32.xlu2 %v1385_v61 }
 0x2e0   :  { %1001 = vpow2.f32 %v452_v43  ;;  %548 = vadd.xlane.f32.xlu1 %v1387_v23 }
 0x2e3   :  { %v1000_v11 = vpop.eup %999  ;;  %v499_v25 = vpop.xlane.xlu2 %498 }
 0x2e4   :  { %1003 = vrcp.f32 %v499_v25  ;;  %v531_v2 = vpop.xlane.xlu1 %530  ;;  %v603_v16 = vmul.f32 %v1000_v11, %v1298_v10 }
 0x2e5   :  { %1005 = vrcp.f32 %v531_v2 }
 0x2e6   :  { %v1392_v53 = vpop.eup %1001  ;;  %710 = vmatmul.f32.gmra.mxu3 %v603_v16 }
 0x2e7   :  { %516 = vadd.xlane.f32.xlu2 %v1392_v53 }
 0x2ea   :  { %v1004_v1 = vpop.eup %1003 }
 0x2eb   :  { %v1006_v52 = vpop.eup %1005  ;;  %v501_v34 = vpop.xlane.xlu2 %500  ;;  %v588_v15 = vmul.f32 %v1004_v1, %v1304_v18 }
 0x2ec   :  { %1007 = vrcp.f32 %v501_v34  ;;  %v533_v62 = vpop.xlane.xlu1 %532  ;;  %v604_v21 = vmul.f32 %v1006_v52, %v1306_v19 }
 0x2ed   :  { %1009 = vrcp.f32 %v533_v62  ;;  %648 = vmatmul.f32.gmra.mxu2 %v588_v15 }
 0x2ee   :  { %713 = vmatmul.f32.gmra.mxu3 %v604_v21 }
 0x2f2   :  { %v1008_v24 = vpop.eup %1007 }
 0x2f3   :  { %v1010_v10 = vpop.eup %1009  ;;  %v503_v0 = vpop.xlane.xlu2 %502  ;;  %v589_v39 = vmul.f32 %v1008_v24, %v1312_v32 }
 0x2f4   :  { %1011 = vrcp.f32 %v503_v0  ;;  %v535_v44 = vpop.xlane.xlu1 %534  ;;  %v605_v45 = vmul.f32 %v1010_v10, %v1314_v33 }
 0x2f5   :  { %1013 = vrcp.f32 %v535_v44  ;;  %651 = vmatmul.f32.gmra.mxu2 %v589_v39 }
 0x2f6   :  { %716 = vmatmul.f32.gmra.mxu3 %v605_v45 }
 0x2fa   :  { %v1012_v18 = vpop.eup %1011 }
 0x2fb   :  { %v1014_v5 = vpop.eup %1013  ;;  %v505_v46 = vpop.xlane.xlu2 %504  ;;  %v590_v19 = vmul.f32 %v1012_v18, %v1324_v20 }
 0x2fc   :  { %1015 = vrcp.f32 %v505_v46  ;;  %v537_v9 = vpop.xlane.xlu1 %536  ;;  %v606_v50 = vmul.f32 %v1014_v5, %v1326_v51 }
 0x2fd   :  { %1017 = vrcp.f32 %v537_v9  ;;  %654 = vmatmul.f32.gmra.mxu2 %v590_v19 }
 0x2fe   :  { %719 = vmatmul.f32.gmra.mxu3 %v606_v50 }
 0x301   :  { %v1407_v26 = vpop.f32.mrf.mxu2 }
 0x302   :  { %v1016_v32 = vpop.eup %1015 }
 0x303   :  { %v1018_v29 = vpop.eup %1017  ;;  %v507_v41 = vpop.xlane.xlu2 %506  ;;  %v591_v33 = vmul.f32 %v1016_v32, %v1333_v63 }
 0x304   :  { %1019 = vrcp.f32 %v507_v41  ;;  %v539_v55 = vpop.xlane.xlu1 %538  ;;  %v607_v59 = vmul.f32 %v1018_v29, %v1335_v48 }
 0x305   :  { %1021 = vrcp.f32 %v539_v55  ;;  %657 = vmatmul.f32.gmra.mxu2 %v591_v33 }
 0x306   :  { %722 = vmatmul.f32.gmra.mxu3 %v607_v59 }
 0x30a   :  { %v1020_v20 = vpop.eup %1019 }
 0x30b   :  { %v1022_v56 = vpop.eup %1021  ;;  %v509_v57 = vpop.xlane.xlu2 %508  ;;  %v592_v51 = vmul.f32 %v1020_v20, %v1341_v3 }
 0x30c   :  { %1023 = vrcp.f32 %v509_v57  ;;  %v541_v22 = vpop.xlane.xlu1 %540  ;;  %v608_v58 = vmul.f32 %v1022_v56, %v1343_v4  ;;  %v1411_v3 = vpop.f32.mrf.mxu2 }
 0x30d   :  { %1025 = vrcp.f32 %v541_v22  ;;  %660 = vmatmul.f32.gmra.mxu2 %v592_v51 }
 0x30e   :  { %725 = vmatmul.f32.gmra.mxu3 %v608_v58 }
 0x312   :  { %v1024_v63 = vpop.eup %1023 }
 0x313   :  { %v1026_v49 = vpop.eup %1025  ;;  %v593_v30 = vmul.f32 %v1024_v63, %v1347_v54 }
 0x314   :  { %v609_v48 = vmul.f32 %v1026_v49, %v1349_v35 }
 0x315   :  { %663 = vmatmul.f32.gmra.mxu2 %v593_v30 }
 0x316   :  { %728 = vmatmul.f32.gmra.mxu3 %v609_v48 }
 0x328   :  { %v1409_v38 = vpop.f32.mrf.mxu3 }
 0x330   :  { %v1413_v31 = vpop.f32.mrf.mxu3 }
 0x331   :  { %v1415_v4 = vpop.f32.mrf.mxu2 }
 0x338   :  { %v1417_v7 = vpop.f32.mrf.mxu3 }
 0x339   :  { %v1419_v42 = vpop.f32.mrf.mxu2 }
 0x33b   :  { %v543_v40 = vpop.xlane.xlu1 %542 }
 0x33c   :  { %1027 = vrcp.f32 %v543_v40 }
 0x340   :  { %v1421_v54 = vpop.f32.mrf.mxu3 }
 0x341   :  { %v643_v35 = vpop.f32.mrf.mxu2 }
 0x342   :  { %v1028_v8 = vpop.eup %1027  ;;  %752 = vrot.lane.b32.xlu2 %v643_v35, %s1043_s1  ;;  %v511_v47 = vpop.xlane.xlu2 %510 }
 0x343   :  { %1029 = vrcp.f32 %v511_v47  ;;  %v545_v28 = vpop.xlane.xlu1 %544  ;;  %v610_v6 = vmul.f32 %v1028_v8, %v1365_v27 }
 0x344   :  { %1031 = vrcp.f32 %v545_v28 }
 0x345   :  { %731 = vmatmul.f32.gmra.mxu3 %v610_v6 }
 0x348   :  { %v708_v12 = vpop.f32.mrf.mxu3 }
 0x349   :  { %v1030_v17 = vpop.eup %1029  ;;  %760 = vrot.lane.b32.xlu1 %v708_v12, %s1043_s1  ;;  %v646_v16 = vpop.f32.mrf.mxu2 }
 0x34a   :  { %v1032_v60 = vpop.eup %1031  ;;  %v513_v43 = vpop.xlane.xlu2 %512  ;;  %v594_v11 = vmul.f32 %v1030_v17, %v1370_v37 }
 0x34b   :  { %1033 = vrcp.f32 %v513_v43  ;;  %v547_v25 = vpop.xlane.xlu1 %546  ;;  %v611_v2 = vmul.f32 %v1032_v60, %v1372_v36 }
 0x34c   :  { %1035 = vrcp.f32 %v547_v25  ;;  %666 = vmatmul.f32.gmra.mxu2 %v594_v11 }
 0x34d   :  { %734 = vmatmul.f32.gmra.mxu3 %v611_v2 }
 0x351   :  { %v1034_v1 = vpop.eup %1033  ;;  %754 = vrot.lane.b32.xlu1 %v646_v16, %s1043_s1 }
 0x352   :  { %v1036_v27 = vpop.eup %1035  ;;  %v515_v52 = vpop.xlane.xlu2 %514  ;;  %v595_v34 = vmul.f32 %v1034_v1, %v1378_v13 }
 0x353   :  { %1037 = vrcp.f32 %v515_v52  ;;  %v549_v15 = vpop.xlane.xlu1 %548  ;;  %v612_v62 = vmul.f32 %v1036_v27, %v1380_v14 }
 0x354   :  { %1039 = vrcp.f32 %v549_v15  ;;  %669 = vmatmul.f32.gmra.mxu2 %v595_v34 }
 0x355   :  { %737 = vmatmul.f32.gmra.mxu3 %v612_v62 }
 0x359   :  { %v1038_v37 = vpop.eup %1037 }
 0x35a   :  { %v1040_v36 = vpop.eup %1039  ;;  %v517_v21 = vpop.xlane.xlu2 %516  ;;  %v596_v24 = vmul.f32 %v1038_v37, %v1385_v61 }
 0x35b   :  { %1041 = vrcp.f32 %v517_v21  ;;  %v613_v10 = vmul.f32 %v1040_v36, %v1387_v23 }
 0x35c   :  { %672 = vmatmul.f32.gmra.mxu2 %v596_v24 }
 0x35d   :  { %740 = vmatmul.f32.gmra.mxu3 %v613_v10 }
 0x361   :  { %v1042_v0 = vpop.eup %1041 }
 0x362   :  { %v597_v13 = vmul.f32 %v1042_v0, %v1392_v53 }
 0x364   :  { %675 = vmatmul.f32.gmra.mxu2 %v597_v13 }
 0x369   :  { %v711_v39 = vpop.f32.mrf.mxu3 }
 0x36a   :  { %762 = vrot.lane.b32.xlu2 %v711_v39, %s1043_s1 }
 0x370   :  { %v649_v14 = vpop.f32.mrf.mxu2 }
 0x371   :  { %v714_v44 = vpop.f32.mrf.mxu3 }
 0x372   :  { %756 = vrot.lane.b32.xlu2 %v649_v14, %s1043_s1  ;;  %764 = vrot.lane.b32.xlu1 %v714_v44, %s1043_s1 }
 0x378   :  { %v652_v45 = vpop.f32.mrf.mxu2 }
 0x379   :  { %v717_v61 = vpop.f32.mrf.mxu3 }
 0x37a   :  { %758 = vrot.lane.b32.xlu2 %v652_v45, %s1043_s1 }
 0x380   :  { %v655_v23 = vpop.f32.mrf.mxu2 }
 0x381   :  { %784 = vrot.lane.b32.xlu1 %v655_v23, %s1044_s24  ;;  %v720_v53 = vpop.f32.mrf.mxu3 }
 0x382   :  { %766 = vrot.lane.b32.xlu2 %v717_v61, %s1043_s1 }
 0x388   :  { %v658_v18 = vpop.f32.mrf.mxu2 }
 0x389   :  { %792 = vrot.lane.b32.xlu1 %v720_v53, %s1044_s24  ;;  %v723_v5 = vpop.f32.mrf.mxu3 }
 0x38a   :  { %786 = vrot.lane.b32.xlu2 %v658_v18, %s1044_s24 }
 0x390   :  { %v661_v46 = vpop.f32.mrf.mxu2 }
 0x391   :  { %788 = vrot.lane.b32.xlu1 %v661_v46, %s1044_s24  ;;  %v726_v19 = vpop.f32.mrf.mxu3 }
 0x392   :  { %794 = vrot.lane.b32.xlu2 %v723_v5, %s1044_s24 }
 0x398   :  { %v664_v9 = vpop.f32.mrf.mxu2 }
 0x399   :  { %796 = vrot.lane.b32.xlu1 %v726_v19, %s1044_s24  ;;  %v729_v50 = vpop.f32.mrf.mxu3 }
 0x39a   :  { %790 = vrot.lane.b32.xlu2 %v664_v9, %s1044_s24 }
 0x39c   :  { %v753_v55 = vpop.permute.xlu2 %752 }
 0x39d   :  { %v840_v27 = vsel %vm67_vm0, %v1407_v26, %v753_v55 }
 0x3a2   :  { %798 = vrot.lane.b32.xlu2 %v729_v50, %s1044_s24 }
 0x3bb   :  { %v761_v63 = vpop.permute.xlu1 %760 }
 0x3bc   :  { %v844_v26 = vsel %vm67_vm0, %v1409_v38, %v761_v63 }
 0x3c3   :  { %v755_v30 = vpop.permute.xlu1 %754 }
 0x3c4   :  { %v763_v20 = vpop.permute.xlu2 %762  ;;  %v841_v17 = vsel %vm67_vm0, %v1411_v3, %v755_v30 }
 0x3c5   :  { %v845_v25 = vsel %vm67_vm0, %v1413_v31, %v763_v20 }
 0x3c8   :  { %v732_v29 = vpop.f32.mrf.mxu3 }
 0x3cc   :  { %v757_v51 = vpop.permute.xlu2 %756 }
 0x3cd   :  { %v842_v38 = vsel %vm67_vm0, %v1415_v4, %v757_v51 }
 0x3cf   :  { %v667_v32 = vpop.f32.mrf.mxu2 }
 0x3d0   :  { %816 = vrot.lane.b32.xlu1 %v667_v32, %s1045_s25  ;;  %v735_v33 = vpop.f32.mrf.mxu3 }
 0x3d4   :  { %v759_v58 = vpop.permute.xlu2 %758 }
 0x3d5   :  { %v843_v52 = vsel %vm67_vm0, %v1419_v42, %v759_v58 }
 0x3d7   :  { %v670_v41 = vpop.f32.mrf.mxu2 }
 0x3d8   :  { %818 = vrot.lane.b32.xlu2 %v670_v41, %s1045_s25  ;;  %824 = vrot.lane.b32.xlu1 %v732_v29, %s1045_s25  ;;  %v738_v56 = vpop.f32.mrf.mxu3 }
 0x3dc   :  { %v767_v49 = vpop.permute.xlu2 %766 }
 0x3dd   :  { %v847_v42 = vsel %vm67_vm0, %v1421_v54, %v767_v49 }
 0x3df   :  { %v673_v59 = vpop.f32.mrf.mxu2 }
 0x3e0   :  { %820 = vrot.lane.b32.xlu1 %v673_v59, %s1045_s25  ;;  %826 = vrot.lane.b32.xlu2 %v735_v33, %s1045_s25  ;;  %v741_v22 = vpop.f32.mrf.mxu3 }
 0x3e4   :  { %v787_v48 = vpop.permute.xlu2 %786  ;;  %v765_v40 = vpop.permute.xlu1 %764 }
 0x3e5   :  { %v850_v60 = vsel %vm848_vm1, %v841_v17, %v787_v48  ;;  %v846_v45 = vsel %vm67_vm0, %v1417_v7, %v765_v40 }
 0x3e7   :  { %v676_v57 = vpop.f32.mrf.mxu2 }
 0x3e8   :  { %822 = vrot.lane.b32.xlu2 %v676_v57, %s1045_s25  ;;  %828 = vrot.lane.b32.xlu1 %v738_v56, %s1045_s25 }
 0x3ec   :  { %v795_v35 = vpop.permute.xlu2 %794 }
 0x3ed   :  { %v854_v2 = vsel %vm848_vm1, %v845_v25, %v795_v35 }
 0x3f0   :  { %830 = vrot.lane.b32.xlu2 %v741_v22, %s1045_s25 }
 0x3f3   :  { %v785_v8 = vpop.permute.xlu1 %784 }
 0x3f4   :  { %v791_v47 = vpop.permute.xlu2 %790  ;;  %v849_v31 = vsel %vm848_vm1, %v840_v27, %v785_v8 }
 0x3f5   :  { %v852_v34 = vsel %vm848_vm1, %v843_v52, %v791_v47 }
 0x3fb   :  { %v793_v28 = vpop.permute.xlu1 %792 }
 0x3fc   :  { %v799_v6 = vpop.permute.xlu2 %798  ;;  %v853_v24 = vsel %vm848_vm1, %v844_v26, %v793_v28 }
 0x3fd   :  { %v856_v21 = vsel %vm848_vm1, %v847_v42, %v799_v6 }
 0x403   :  { %v789_v12 = vpop.permute.xlu1 %788 }
 0x404   :  { %v851_v54 = vsel %vm848_vm1, %v842_v38, %v789_v12 }
 0x40b   :  { %v797_v16 = vpop.permute.xlu1 %796 }
 0x40c   :  { %v855_v61 = vsel %vm848_vm1, %v846_v45, %v797_v16 }
 0x432   :  { %v819_v43 = vpop.permute.xlu2 %818 }
 0x433   :  { %v859_v11 = vsel %vm857_vm2, %v850_v60, %v819_v43 }
 0x434   :  { %868 = vst.msk [vmem:[%s1505_s2 + $0x8] sm:$0xff] %vm866_vm3, %v859_v11 }
 0x43a   :  { %v827_v1 = vpop.permute.xlu2 %826 }
 0x43b   :  { %v863_v3 = vsel %vm857_vm2, %v854_v2, %v827_v1 }
 0x43c   :  { %872 = vst.msk [vmem:[%s1505_s2 + $0x28] sm:$0xff] %vm866_vm3, %v863_v3 }
 0x442   :  { %v823_v15 = vpop.permute.xlu2 %822  ;;  %v817_v62 = vpop.permute.xlu1 %816 }
 0x443   :  { %v861_v37 = vsel %vm857_vm2, %v852_v34, %v823_v15  ;;  %v858_v36 = vsel %vm857_vm2, %v849_v31, %v817_v62 }
 0x444   :  { %870 = vst.msk [vmem:[%s1505_s2 + $0x18] sm:$0xff] %vm866_vm3, %v861_v37 }
 0x445   :  { %867 = vst.msk [vmem:[%s1505_s2] sm:$0xff] %vm866_vm3, %v858_v36 }
 0x44a   :  { %v831_v10 = vpop.permute.xlu2 %830  ;;  %v825_v0 = vpop.permute.xlu1 %824 }
 0x44b   :  { %v865_v13 = vsel %vm857_vm2, %v856_v21, %v831_v10  ;;  %v862_v39 = vsel %vm857_vm2, %v853_v24, %v825_v0 }
 0x44c   :  { %874 = vst.msk [vmem:[%s1505_s2 + $0x38] sm:$0xff] %vm866_vm3, %v865_v13 }
 0x44d   :  { %871 = vst.msk [vmem:[%s1505_s2 + $0x20] sm:$0xff] %vm866_vm3, %v862_v39 }
 0x452   :  { %v821_v14 = vpop.permute.xlu1 %820 }
 0x453   :  { %v860_v44 = vsel %vm857_vm2, %v851_v54, %v821_v14 }
 0x454   :  { %869 = vst.msk [vmem:[%s1505_s2 + $0x10] sm:$0xff] %vm866_vm3, %v860_v44 }
 0x45a   :  { %v829_v23 = vpop.permute.xlu1 %828 }
 0x45b   :  { %v864_v53 = vsel %vm857_vm2, %v855_v61, %v829_v23 }
 0x45c   :  { %873 = vst.msk [vmem:[%s1505_s2 + $0x30] sm:$0xff] %vm866_vm3, %v864_v53 }

</bundles_post_ra>
